<compile_context>
chip_gen: v6e
topology: v6e:2x2x1
jax: 0.10.0
libtpu: 0.0.40
codegen_flags: <defaults>
</compile_context>

<pallas_src>
import functools

import jax
import jax.numpy as jnp
from jax.experimental import pallas as pl
from jax.experimental.pallas import tpu as pltpu

D_MODEL = 128
D_FF = 256
N_LAYERS = 3
N_HEADS = 8          # head_dim = 16; seq_len == 1 -> softmax weights are all 1
N_CLASSES = 2
LN_EPS = 1e-5        # PyTorch LayerNorm default

# Row layout of the packed "vecs" slab (f32, width 256).
VROWS_PER_LAYER = 8
R_BATTN, R_B1, R_B2, R_G1, R_BE1, R_G2, R_BE2 = range(7)
GLOBAL_BASE = VROWS_PER_LAYER * N_LAYERS        # global rows start here
R_BEMB = GLOBAL_BASE + 0
R_BFC = GLOBAL_BASE + 1
VEC_ROWS = GLOBAL_BASE + 8                      # padded to a multiple of 8 rows


def _round_up(x, m):
    return (x + m - 1) // m * m


def _cdiv(a, b):
    return (a + b - 1) // b


def _layer_norm(v, gamma, beta):
    # One-pass variance: var = E[x^2] - E[x]^2 (biased, matches PyTorch LN).
    s1 = jnp.mean(v, axis=-1, keepdims=True)
    s2 = jnp.mean(v * v, axis=-1, keepdims=True)
    var = s2 - s1 * s1
    return (v - s1) * jax.lax.rsqrt(var + LN_EPS) * gamma + beta


def transformer_kernel(x_ref, wef_ref, ma_ref, mb_ref, vec_ref, out_ref):
    """One (bm, *) batch tile; all weights resident in VMEM (bf16).

    x_ref  : (bm, idp)            f32   zero-padded inputs
    wef_ref: (idp + 128, 128)     bf16  [W_emb ; W_fc zero-padded to 128 cols]
    ma_ref : (N_LAYERS, 128, 384) bf16  per layer: [I + Wv@Wo | W1]
    mb_ref : (N_LAYERS, 256, 128) bf16  per layer: W2
    vec_ref: (VEC_ROWS, 256)      f32   biases / LayerNorm params (R_* rows)
    out_ref: (bm, 128)            bf16  lane-dense logits (cols 0:2 are real)
    """
    f32, bf16 = jnp.float32, jnp.bfloat16
    idp = x_ref.shape[1]

    def mm(act_f32, w_bf16):
        # bf16 x bf16 operands, f32 MXU accumulation.
        return jnp.dot(act_f32.astype(bf16), w_bf16, preferred_element_type=f32)

    w_emb = wef_ref[0:idp, :]                                   # bf16
    b_emb = vec_ref[R_BEMB:R_BEMB + 1, 0:D_MODEL]               # f32
    h = mm(x_ref[...], w_emb) + b_emb

    for l in range(N_LAYERS):                                   # static unroll
        base = VROWS_PER_LAYER * l
        wa = ma_ref[l, :, 0:D_MODEL]                            # I + Wv @ Wo
        w1 = ma_ref[l, :, D_MODEL:D_MODEL + D_FF]
        w2 = mb_ref[l]
        b_attn = vec_ref[base + R_BATTN:base + R_BATTN + 1, 0:D_MODEL]
        b1 = vec_ref[base + R_B1:base + R_B1 + 1, :]
        b2 = vec_ref[base + R_B2:base + R_B2 + 1, 0:D_MODEL]
        g1 = vec_ref[base + R_G1:base + R_G1 + 1, 0:D_MODEL]
        be1 = vec_ref[base + R_BE1:base + R_BE1 + 1, 0:D_MODEL]
        g2 = vec_ref[base + R_G2:base + R_G2 + 1, 0:D_MODEL]
        be2 = vec_ref[base + R_BE2:base + R_BE2 + 1, 0:D_MODEL]

        # --- self-attention block (seq_len == 1; residual folded into wa) ---
        h = _layer_norm(mm(h, wa) + b_attn, g1, be1)

        # --- feed-forward block (ReLU, post-norm) ---
        ff = jnp.maximum(mm(h, w1) + b1, 0.0)
        ff = mm(ff, w2) + b2
        h = _layer_norm(h + ff, g2, be2)

    # self.dropout is identity in eval mode; fc zero-padded to 128 lane-dense
    # columns; output written as bf16 to halve HBM writeback.
    # TODO(synk): training-mode dropout (p=0.5) not implemented; inference only.
    wfc = wef_ref[idp:idp + D_MODEL, :]
    bfc = vec_ref[R_BFC:R_BFC + 1, 0:D_MODEL]
    out_ref[...] = (mm(h, wfc) + bfc).astype(out_ref.dtype)


def init_raw_params(key, input_dim):
    """Deterministic synthetic parameters matching the PyTorch module shapes.

    PyTorch weights are (out, in); we pre-transpose to (in, out) so everything
    computes x @ W. Only the V slice of each MHA in_proj matters (seq_len==1).
    """
    keys = iter(jax.random.split(key, 4 + 8 * N_LAYERS))

    def rnd(shape, fan_in):
        bound = 1.0 / (fan_in ** 0.5)
        return jax.random.uniform(next(keys), shape, jnp.float32, -bound, bound)

    w_emb = rnd((D_MODEL, input_dim), input_dim)       # nn.Linear(input_dim, 128)
    b_emb = rnd((D_MODEL,), input_dim)

    wv, bv, wo, bo, w1, b1, w2, b2 = ([] for _ in range(8))
    for _ in range(N_LAYERS):
        in_proj_w = rnd((3 * D_MODEL, D_MODEL), D_MODEL)   # MHA in_proj_weight
        in_proj_b = rnd((3 * D_MODEL,), D_MODEL)           # MHA in_proj_bias
        out_w = rnd((D_MODEL, D_MODEL), D_MODEL)           # MHA out_proj
        out_b = rnd((D_MODEL,), D_MODEL)
        lin1_w = rnd((D_FF, D_MODEL), D_MODEL)             # linear1 (128 -> 256)
        lin1_b = rnd((D_FF,), D_MODEL)
        lin2_w = rnd((D_MODEL, D_FF), D_FF)                # linear2 (256 -> 128)
        lin2_b = rnd((D_MODEL,), D_FF)

        wv.append(in_proj_w[2 * D_MODEL:].T)   # V slice only (seq_len == 1)
        bv.append(in_proj_b[2 * D_MODEL:])
        wo.append(out_w.T)
        bo.append(out_b)
        w1.append(lin1_w.T)
        b1.append(lin1_b)
        w2.append(lin2_w.T)
        b2.append(lin2_b)

    fc_w = rnd((N_CLASSES, D_MODEL), D_MODEL)              # nn.Linear(128, 2)
    fc_b = rnd((N_CLASSES,), D_MODEL)

    ones = jnp.ones((N_LAYERS, D_MODEL), jnp.float32)
    zeros = jnp.zeros((N_LAYERS, D_MODEL), jnp.float32)
    return dict(
        w_emb=w_emb.T, b_emb=b_emb,
        wv=jnp.stack(wv), bv=jnp.stack(bv), wo=jnp.stack(wo), bo=jnp.stack(bo),
        w1=jnp.stack(w1), b1=jnp.stack(b1), w2=jnp.stack(w2), b2=jnp.stack(b2),
        g1=ones, be1=zeros, g2=ones, be2=zeros,            # LayerNorm defaults
        wfc=fc_w.T, bfc=fc_b,
    )


def pack_params(raw, input_dim):
    """Fold Wv@Wo (+residual) and pack everything into 4 slabs (bf16 weights)."""
    f32, bf16 = jnp.float32, jnp.bfloat16
    idp = _round_up(input_dim, 16)     # sublane-aligned slice boundaries (bf16)

    # --- embedding + fc weights, padded and concatenated along rows ---
    w_emb = jnp.zeros((idp, D_MODEL), f32).at[:input_dim].set(raw["w_emb"])
    wfc = jnp.zeros((D_MODEL, D_MODEL), f32).at[:, :N_CLASSES].set(raw["wfc"])
    w_emb_fc = jnp.concatenate([w_emb, wfc], axis=0).astype(bf16)

    eye = jnp.eye(D_MODEL, dtype=f32)
    ma, mb, vec_blocks = [], [], []
    for l in range(N_LAYERS):
        w_attn = eye + raw["wv"][l] @ raw["wo"][l]           # residual folded in
        b_attn = raw["bv"][l] @ raw["wo"][l] + raw["bo"][l]
        ma.append(jnp.concatenate([w_attn, raw["w1"][l]], axis=1))   # (128, 384)
        mb.append(raw["w2"][l])                                       # (256, 128)

        rows = jnp.zeros((VROWS_PER_LAYER, 256), f32)
        rows = rows.at[R_BATTN, :D_MODEL].set(b_attn)
        rows = rows.at[R_B1, :].set(raw["b1"][l])
        rows = rows.at[R_B2, :D_MODEL].set(raw["b2"][l])
        rows = rows.at[R_G1, :D_MODEL].set(raw["g1"][l])
        rows = rows.at[R_BE1, :D_MODEL].set(raw["be1"][l])
        rows = rows.at[R_G2, :D_MODEL].set(raw["g2"][l])
        rows = rows.at[R_BE2, :D_MODEL].set(raw["be2"][l])
        vec_blocks.append(rows)

    grows = jnp.zeros((VEC_ROWS - GLOBAL_BASE, 256), f32)
    grows = grows.at[0, :D_MODEL].set(raw["b_emb"])
    grows = grows.at[1, :N_CLASSES].set(raw["bfc"])
    vecs = jnp.concatenate(vec_blocks + [grows], axis=0)      # (VEC_ROWS, 256)

    return dict(
        w_emb_fc=w_emb_fc,
        mats_a=jnp.stack(ma).astype(bf16),   # (N_LAYERS, 128, 384)
        mats_b=jnp.stack(mb).astype(bf16),   # (N_LAYERS, 256, 128)
        vecs=vecs,                           # (VEC_ROWS, 256) f32
    )


def _choose_tiling(B, block_rows):
    """Pick (bm, b_pad): 16-row aligned, balanced tiles, >= 2 tiles when the
    padded batch allows it (keeps both v7x TensorCores busy)."""
    b16 = _round_up(max(B, 1), 16)
    n_tiles = _cdiv(b16, block_rows)
    if b16 >= 32:                          # enough rows for two 16-row tiles
        n_tiles = max(n_tiles, 2)
    bm = _round_up(_cdiv(b16, n_tiles), 16)
    n_tiles = _cdiv(b16, bm)
    return bm, bm * n_tiles


@functools.partial(jax.jit, static_argnames=("block_rows",))
def transformer_forward(x, packed, block_rows=1024):
    B, input_dim = x.shape
    idp = packed["w_emb_fc"].shape[0] - D_MODEL

    bm, b_pad = _choose_tiling(B, block_rows)
    xp = jnp.zeros((b_pad, idp), jnp.float32).at[:B, :input_dim].set(x)

    params = (packed["w_emb_fc"], packed["mats_a"], packed["mats_b"],
              packed["vecs"])

    def const_spec(arr):
        nd = arr.ndim
        return pl.BlockSpec(arr.shape, lambda i, _nd=nd: (0,) * _nd)

    flops_per_row = 2 * (idp * D_MODEL
                         + N_LAYERS * (D_MODEL * D_MODEL + 2 * D_MODEL * D_FF)
                         + D_MODEL * D_MODEL)
    param_bytes = sum(int(a.size) * a.dtype.itemsize for a in params)
    cost = pl.CostEstimate(
        flops=b_pad * flops_per_row,
        transcendentals=2 * N_LAYERS * b_pad,     # one rsqrt per LayerNorm row
        bytes_accessed=param_bytes + xp.size * 4 + b_pad * D_MODEL * 2,
    )

    out = pl.pallas_call(
        transformer_kernel,
        out_shape=jax.ShapeDtypeStruct((b_pad, D_MODEL), jnp.bfloat16),
        grid=(b_pad // bm,),
        in_specs=[pl.BlockSpec((bm, idp), lambda i: (i, 0))]
                 + [const_spec(a) for a in params],
        out_specs=pl.BlockSpec((bm, D_MODEL), lambda i: (i, 0)),
        compiler_params=pltpu.CompilerParams(
            dimension_semantics=("parallel",),
            vmem_limit_bytes=32 * 1024 * 1024),   # v5e default is only 16 MiB
        cost_estimate=cost,
    )(xp, *params)

    return out[:B, :N_CLASSES].astype(jnp.float32)


def reference_forward_packed(x, packed, input_dim):
    """Pure-JAX reference with the same folded / bf16-operand math (tight tol)."""
    f32, bf16 = jnp.float32, jnp.bfloat16
    idp = packed["w_emb_fc"].shape[0] - D_MODEL
    xp = jnp.zeros((x.shape[0], idp), f32).at[:, :input_dim].set(x)
    wef, ma, mb = packed["w_emb_fc"], packed["mats_a"], packed["mats_b"]
    vec = packed["vecs"]

    def mm(a, w):
        return jnp.dot(a.astype(bf16), w, preferred_element_type=f32)

    h = mm(xp, wef[:idp]) + vec[R_BEMB:R_BEMB + 1, :D_MODEL]
    for l in range(N_LAYERS):
        base = VROWS_PER_LAYER * l
        h = _layer_norm(mm(h, ma[l, :, :D_MODEL])
                        + vec[base + R_BATTN:base + R_BATTN + 1, :D_MODEL],
                        vec[base + R_G1:base + R_G1 + 1, :D_MODEL],
                        vec[base + R_BE1:base + R_BE1 + 1, :D_MODEL])
        ff = jnp.maximum(mm(h, ma[l, :, D_MODEL:])
                         + vec[base + R_B1:base + R_B1 + 1, :], 0.0)
        ff = mm(ff, mb[l]) + vec[base + R_B2:base + R_B2 + 1, :D_MODEL]
        h = _layer_norm(h + ff,
                        vec[base + R_G2:base + R_G2 + 1, :D_MODEL],
                        vec[base + R_BE2:base + R_BE2 + 1, :D_MODEL])
    out = mm(h, wef[idp:]) + vec[R_BFC:R_BFC + 1, :D_MODEL]
    return out[:, :N_CLASSES]


def reference_forward_raw(x, raw):
    """Unfolded f32 reference (validates the algebraic fold; loose tolerance)."""
    h = x @ raw["w_emb"] + raw["b_emb"]
    for l in range(N_LAYERS):
        v = h @ raw["wv"][l] + raw["bv"][l]
        attn = v @ raw["wo"][l] + raw["bo"][l]
        h = _layer_norm(h + attn, raw["g1"][l], raw["be1"][l])
        ff = jnp.maximum(h @ raw["w1"][l] + raw["b1"][l], 0.0)
        ff = ff @ raw["w2"][l] + raw["b2"][l]
        h = _layer_norm(h + ff, raw["g2"][l], raw["be2"][l])
    return h @ raw["wfc"] + raw["bfc"]


if __name__ == "__main__":
    key = jax.random.PRNGKey(0)
    kx, kp = jax.random.split(key)

    B, input_dim = 8, 32
    x = jax.random.normal(kx, (B, input_dim), dtype=jnp.float32)
    raw = init_raw_params(kp, input_dim)
    packed = pack_params(raw, input_dim)

    out = transformer_forward(x, packed)
    jax.block_until_ready(out)

    assert out.shape == (B, N_CLASSES)
    assert bool(jnp.all(jnp.isfinite(out)))

    # Tight check against the identical folded / bf16-operand math
    # (reference logits rounded through bf16 to mirror the kernel's output).
    ref_exact = reference_forward_packed(x, packed, input_dim)
    ref_exact_q = ref_exact.astype(jnp.bfloat16).astype(jnp.float32)
    assert bool(jnp.allclose(out, ref_exact_q, atol=5e-3, rtol=5e-3))

    # Loose check against the original unfolded f32 math (fold + bf16 rounding
    # of both weights and activations).
    ref_raw = reference_forward_raw(x, raw)
    assert bool(jnp.allclose(out, ref_raw, atol=1e-1, rtol=1e-1))

    print("KERNEL_OK")
</pallas_src>

<mosaic_0001>
module attributes {stable_mosaic.version = 11 : i64} {
  func.func @transformer_kernel(%arg0: i32, %arg1: memref<16x32xf32, #tpu.memory_space<vmem>>, %arg2: memref<160x128xbf16, #tpu.memory_space<vmem>>, %arg3: memref<3x128x384xbf16, #tpu.memory_space<vmem>>, %arg4: memref<3x256x128xbf16, #tpu.memory_space<vmem>>, %arg5: memref<32x256xf32, #tpu.memory_space<vmem>>, %arg6: memref<16x128xbf16, #tpu.memory_space<vmem>>) attributes {dimension_semantics = [#tpu.dimension_semantics<parallel>], iteration_bounds = array<i64: 1>, scalar_prefetch = 0 : i64, scratch_operands = 0 : i64, tpu.core_type = #tpu.core_type<tc>, window_params = [{transform_indices = @transform_0, window_bounds = array<i64: 16, 32>}, {pipeline_mode = #tpu.pipeline_mode<synchronous>, transform_indices = @transform_1, window_bounds = array<i64: 160, 128>}, {pipeline_mode = #tpu.pipeline_mode<synchronous>, transform_indices = @transform_2, window_bounds = array<i64: 3, 128, 384>}, {pipeline_mode = #tpu.pipeline_mode<synchronous>, transform_indices = @transform_3, window_bounds = array<i64: 3, 256, 128>}, {pipeline_mode = #tpu.pipeline_mode<synchronous>, transform_indices = @transform_4, window_bounds = array<i64: 32, 256>}, {transform_indices = @transform_5, window_bounds = array<i64: 16, 128>}]} {
    %c0 = arith.constant 0 : index
    %c0_0 = arith.constant 0 : index
    %0 = vector.load %arg2[%c0, %c0_0] : memref<160x128xbf16, #tpu.memory_space<vmem>>, vector<32x128xbf16>
    %c24 = arith.constant 24 : index
    %c0_1 = arith.constant 0 : index
    %1 = vector.load %arg5[%c24, %c0_1] : memref<32x256xf32, #tpu.memory_space<vmem>>, vector<1x128xf32>
    %c0_2 = arith.constant 0 : index
    %c0_3 = arith.constant 0 : index
    %2 = vector.load %arg1[%c0_2, %c0_3] : memref<16x32xf32, #tpu.memory_space<vmem>>, vector<16x32xf32>
    %3 = arith.truncf %2 : vector<16x32xf32> to vector<16x32xbf16>
    %cst = arith.constant dense<0.000000e+00> : vector<16x128xf32>
    %4 = tpu.matmul %3, %0, %cst {dimension_numbers = #tpu.dot_dimension_numbers<[1], [0], [0], [1], [0, 0, 1, 1], [], []>} : vector<16x32xbf16>, vector<32x128xbf16>, vector<16x128xf32> -> vector<16x128xf32>
    %5 = vector.broadcast %1 : vector<1x128xf32> to vector<16x128xf32>
    %6 = arith.addf %4, %5 : vector<16x128xf32>
    %c0_4 = arith.constant 0 : index
    %c0_5 = arith.constant 0 : index
    %c0_6 = arith.constant 0 : index
    %7 = vector.load %arg3[%c0_4, %c0_5, %c0_6] : memref<3x128x384xbf16, #tpu.memory_space<vmem>>, vector<1x128x128xbf16>
    %8 = vector.shape_cast %7 : vector<1x128x128xbf16> to vector<128x128xbf16>
    %c0_7 = arith.constant 0 : index
    %c0_8 = arith.constant 0 : index
    %c128 = arith.constant 128 : index
    %9 = vector.load %arg3[%c0_7, %c0_8, %c128] : memref<3x128x384xbf16, #tpu.memory_space<vmem>>, vector<1x128x256xbf16>
    %10 = vector.shape_cast %9 : vector<1x128x256xbf16> to vector<128x256xbf16>
    %c0_9 = arith.constant 0 : index
    %c0_10 = arith.constant 0 : index
    %c0_11 = arith.constant 0 : index
    %11 = vector.load %arg4[%c0_9, %c0_10, %c0_11] : memref<3x256x128xbf16, #tpu.memory_space<vmem>>, vector<1x256x128xbf16>
    %12 = vector.shape_cast %11 : vector<1x256x128xbf16> to vector<256x128xbf16>
    %c0_12 = arith.constant 0 : index
    %c0_13 = arith.constant 0 : index
    %13 = vector.load %arg5[%c0_12, %c0_13] : memref<32x256xf32, #tpu.memory_space<vmem>>, vector<1x128xf32>
    %c1 = arith.constant 1 : index
    %c0_14 = arith.constant 0 : index
    %14 = vector.load %arg5[%c1, %c0_14] : memref<32x256xf32, #tpu.memory_space<vmem>>, vector<1x256xf32>
    %c2 = arith.constant 2 : index
    %c0_15 = arith.constant 0 : index
    %15 = vector.load %arg5[%c2, %c0_15] : memref<32x256xf32, #tpu.memory_space<vmem>>, vector<1x128xf32>
    %c3 = arith.constant 3 : index
    %c0_16 = arith.constant 0 : index
    %16 = vector.load %arg5[%c3, %c0_16] : memref<32x256xf32, #tpu.memory_space<vmem>>, vector<1x128xf32>
    %c4 = arith.constant 4 : index
    %c0_17 = arith.constant 0 : index
    %17 = vector.load %arg5[%c4, %c0_17] : memref<32x256xf32, #tpu.memory_space<vmem>>, vector<1x128xf32>
    %c5 = arith.constant 5 : index
    %c0_18 = arith.constant 0 : index
    %18 = vector.load %arg5[%c5, %c0_18] : memref<32x256xf32, #tpu.memory_space<vmem>>, vector<1x128xf32>
    %c6 = arith.constant 6 : index
    %c0_19 = arith.constant 0 : index
    %19 = vector.load %arg5[%c6, %c0_19] : memref<32x256xf32, #tpu.memory_space<vmem>>, vector<1x128xf32>
    %20 = arith.truncf %6 : vector<16x128xf32> to vector<16x128xbf16>
    %cst_20 = arith.constant dense<0.000000e+00> : vector<16x128xf32>
    %21 = tpu.matmul %20, %8, %cst_20 {dimension_numbers = #tpu.dot_dimension_numbers<[1], [0], [0], [1], [0, 0, 1, 1], [], []>} : vector<16x128xbf16>, vector<128x128xbf16>, vector<16x128xf32> -> vector<16x128xf32>
    %22 = vector.broadcast %13 : vector<1x128xf32> to vector<16x128xf32>
    %23 = arith.addf %21, %22 : vector<16x128xf32>
    %cst_21 = arith.constant dense<0.000000e+00> : vector<16xf32>
    %24 = vector.multi_reduction <add>, %23, %cst_21 [1] : vector<16x128xf32> to vector<16xf32>
    %25 = vector.shape_cast %24 : vector<16xf32> to vector<16x1xf32>
    %cst_22 = arith.constant 1.280000e+02 : f32
    %26 = vector.broadcast %cst_22 : f32 to vector<16x1xf32>
    %27 = arith.divf %25, %26 : vector<16x1xf32>
    %28 = arith.mulf %23, %23 : vector<16x128xf32>
    %cst_23 = arith.constant dense<0.000000e+00> : vector<16xf32>
    %29 = vector.multi_reduction <add>, %28, %cst_23 [1] : vector<16x128xf32> to vector<16xf32>
    %30 = vector.shape_cast %29 : vector<16xf32> to vector<16x1xf32>
    %cst_24 = arith.constant 1.280000e+02 : f32
    %31 = vector.broadcast %cst_24 : f32 to vector<16x1xf32>
    %32 = arith.divf %30, %31 : vector<16x1xf32>
    %33 = arith.mulf %27, %27 : vector<16x1xf32>
    %34 = arith.subf %32, %33 : vector<16x1xf32>
    %35 = vector.broadcast %27 : vector<16x1xf32> to vector<16x128xf32>
    %36 = arith.subf %23, %35 : vector<16x128xf32>
    %cst_25 = arith.constant 9.99999974E-6 : f32
    %37 = vector.broadcast %cst_25 : f32 to vector<16x1xf32>
    %38 = arith.addf %34, %37 : vector<16x1xf32>
    %39 = math.rsqrt %38 : vector<16x1xf32>
    %40 = vector.broadcast %39 : vector<16x1xf32> to vector<16x128xf32>
    %41 = arith.mulf %36, %40 : vector<16x128xf32>
    %42 = vector.broadcast %16 : vector<1x128xf32> to vector<16x128xf32>
    %43 = arith.mulf %41, %42 : vector<16x128xf32>
    %44 = vector.broadcast %17 : vector<1x128xf32> to vector<16x128xf32>
    %45 = arith.addf %43, %44 : vector<16x128xf32>
    %46 = arith.truncf %45 : vector<16x128xf32> to vector<16x128xbf16>
    %cst_26 = arith.constant dense<0.000000e+00> : vector<16x256xf32>
    %47 = tpu.matmul %46, %10, %cst_26 {dimension_numbers = #tpu.dot_dimension_numbers<[1], [0], [0], [1], [0, 0, 1, 1], [], []>} : vector<16x128xbf16>, vector<128x256xbf16>, vector<16x256xf32> -> vector<16x256xf32>
    %48 = vector.broadcast %14 : vector<1x256xf32> to vector<16x256xf32>
    %49 = arith.addf %47, %48 : vector<16x256xf32>
    %cst_27 = arith.constant 0.000000e+00 : f32
    %50 = vector.broadcast %cst_27 : f32 to vector<16x256xf32>
    %51 = arith.maximumf %49, %50 : vector<16x256xf32>
    %52 = arith.truncf %51 : vector<16x256xf32> to vector<16x256xbf16>
    %cst_28 = arith.constant dense<0.000000e+00> : vector<16x128xf32>
    %53 = tpu.matmul %52, %12, %cst_28 {dimension_numbers = #tpu.dot_dimension_numbers<[1], [0], [0], [1], [0, 0, 1, 1], [], []>} : vector<16x256xbf16>, vector<256x128xbf16>, vector<16x128xf32> -> vector<16x128xf32>
    %54 = vector.broadcast %15 : vector<1x128xf32> to vector<16x128xf32>
    %55 = arith.addf %53, %54 : vector<16x128xf32>
    %56 = arith.addf %45, %55 : vector<16x128xf32>
    %cst_29 = arith.constant dense<0.000000e+00> : vector<16xf32>
    %57 = vector.multi_reduction <add>, %56, %cst_29 [1] : vector<16x128xf32> to vector<16xf32>
    %58 = vector.shape_cast %57 : vector<16xf32> to vector<16x1xf32>
    %cst_30 = arith.constant 1.280000e+02 : f32
    %59 = vector.broadcast %cst_30 : f32 to vector<16x1xf32>
    %60 = arith.divf %58, %59 : vector<16x1xf32>
    %61 = arith.mulf %56, %56 : vector<16x128xf32>
    %cst_31 = arith.constant dense<0.000000e+00> : vector<16xf32>
    %62 = vector.multi_reduction <add>, %61, %cst_31 [1] : vector<16x128xf32> to vector<16xf32>
    %63 = vector.shape_cast %62 : vector<16xf32> to vector<16x1xf32>
    %cst_32 = arith.constant 1.280000e+02 : f32
    %64 = vector.broadcast %cst_32 : f32 to vector<16x1xf32>
    %65 = arith.divf %63, %64 : vector<16x1xf32>
    %66 = arith.mulf %60, %60 : vector<16x1xf32>
    %67 = arith.subf %65, %66 : vector<16x1xf32>
    %68 = vector.broadcast %60 : vector<16x1xf32> to vector<16x128xf32>
    %69 = arith.subf %56, %68 : vector<16x128xf32>
    %cst_33 = arith.constant 9.99999974E-6 : f32
    %70 = vector.broadcast %cst_33 : f32 to vector<16x1xf32>
    %71 = arith.addf %67, %70 : vector<16x1xf32>
    %72 = math.rsqrt %71 : vector<16x1xf32>
    %73 = vector.broadcast %72 : vector<16x1xf32> to vector<16x128xf32>
    %74 = arith.mulf %69, %73 : vector<16x128xf32>
    %75 = vector.broadcast %18 : vector<1x128xf32> to vector<16x128xf32>
    %76 = arith.mulf %74, %75 : vector<16x128xf32>
    %77 = vector.broadcast %19 : vector<1x128xf32> to vector<16x128xf32>
    %78 = arith.addf %76, %77 : vector<16x128xf32>
    %c1_34 = arith.constant 1 : index
    %c0_35 = arith.constant 0 : index
    %c0_36 = arith.constant 0 : index
    %79 = vector.load %arg3[%c1_34, %c0_35, %c0_36] : memref<3x128x384xbf16, #tpu.memory_space<vmem>>, vector<1x128x128xbf16>
    %80 = vector.shape_cast %79 : vector<1x128x128xbf16> to vector<128x128xbf16>
    %c1_37 = arith.constant 1 : index
    %c0_38 = arith.constant 0 : index
    %c128_39 = arith.constant 128 : index
    %81 = vector.load %arg3[%c1_37, %c0_38, %c128_39] : memref<3x128x384xbf16, #tpu.memory_space<vmem>>, vector<1x128x256xbf16>
    %82 = vector.shape_cast %81 : vector<1x128x256xbf16> to vector<128x256xbf16>
    %c1_40 = arith.constant 1 : index
    %c0_41 = arith.constant 0 : index
    %c0_42 = arith.constant 0 : index
    %83 = vector.load %arg4[%c1_40, %c0_41, %c0_42] : memref<3x256x128xbf16, #tpu.memory_space<vmem>>, vector<1x256x128xbf16>
    %84 = vector.shape_cast %83 : vector<1x256x128xbf16> to vector<256x128xbf16>
    %c8 = arith.constant 8 : index
    %c0_43 = arith.constant 0 : index
    %85 = vector.load %arg5[%c8, %c0_43] : memref<32x256xf32, #tpu.memory_space<vmem>>, vector<1x128xf32>
    %c9 = arith.constant 9 : index
    %c0_44 = arith.constant 0 : index
    %86 = vector.load %arg5[%c9, %c0_44] : memref<32x256xf32, #tpu.memory_space<vmem>>, vector<1x256xf32>
    %c10 = arith.constant 10 : index
    %c0_45 = arith.constant 0 : index
    %87 = vector.load %arg5[%c10, %c0_45] : memref<32x256xf32, #tpu.memory_space<vmem>>, vector<1x128xf32>
    %c11 = arith.constant 11 : index
    %c0_46 = arith.constant 0 : index
    %88 = vector.load %arg5[%c11, %c0_46] : memref<32x256xf32, #tpu.memory_space<vmem>>, vector<1x128xf32>
    %c12 = arith.constant 12 : index
    %c0_47 = arith.constant 0 : index
    %89 = vector.load %arg5[%c12, %c0_47] : memref<32x256xf32, #tpu.memory_space<vmem>>, vector<1x128xf32>
    %c13 = arith.constant 13 : index
    %c0_48 = arith.constant 0 : index
    %90 = vector.load %arg5[%c13, %c0_48] : memref<32x256xf32, #tpu.memory_space<vmem>>, vector<1x128xf32>
    %c14 = arith.constant 14 : index
    %c0_49 = arith.constant 0 : index
    %91 = vector.load %arg5[%c14, %c0_49] : memref<32x256xf32, #tpu.memory_space<vmem>>, vector<1x128xf32>
    %92 = arith.truncf %78 : vector<16x128xf32> to vector<16x128xbf16>
    %cst_50 = arith.constant dense<0.000000e+00> : vector<16x128xf32>
    %93 = tpu.matmul %92, %80, %cst_50 {dimension_numbers = #tpu.dot_dimension_numbers<[1], [0], [0], [1], [0, 0, 1, 1], [], []>} : vector<16x128xbf16>, vector<128x128xbf16>, vector<16x128xf32> -> vector<16x128xf32>
    %94 = vector.broadcast %85 : vector<1x128xf32> to vector<16x128xf32>
    %95 = arith.addf %93, %94 : vector<16x128xf32>
    %cst_51 = arith.constant dense<0.000000e+00> : vector<16xf32>
    %96 = vector.multi_reduction <add>, %95, %cst_51 [1] : vector<16x128xf32> to vector<16xf32>
    %97 = vector.shape_cast %96 : vector<16xf32> to vector<16x1xf32>
    %cst_52 = arith.constant 1.280000e+02 : f32
    %98 = vector.broadcast %cst_52 : f32 to vector<16x1xf32>
    %99 = arith.divf %97, %98 : vector<16x1xf32>
    %100 = arith.mulf %95, %95 : vector<16x128xf32>
    %cst_53 = arith.constant dense<0.000000e+00> : vector<16xf32>
    %101 = vector.multi_reduction <add>, %100, %cst_53 [1] : vector<16x128xf32> to vector<16xf32>
    %102 = vector.shape_cast %101 : vector<16xf32> to vector<16x1xf32>
    %cst_54 = arith.constant 1.280000e+02 : f32
    %103 = vector.broadcast %cst_54 : f32 to vector<16x1xf32>
    %104 = arith.divf %102, %103 : vector<16x1xf32>
    %105 = arith.mulf %99, %99 : vector<16x1xf32>
    %106 = arith.subf %104, %105 : vector<16x1xf32>
    %107 = vector.broadcast %99 : vector<16x1xf32> to vector<16x128xf32>
    %108 = arith.subf %95, %107 : vector<16x128xf32>
    %cst_55 = arith.constant 9.99999974E-6 : f32
    %109 = vector.broadcast %cst_55 : f32 to vector<16x1xf32>
    %110 = arith.addf %106, %109 : vector<16x1xf32>
    %111 = math.rsqrt %110 : vector<16x1xf32>
    %112 = vector.broadcast %111 : vector<16x1xf32> to vector<16x128xf32>
    %113 = arith.mulf %108, %112 : vector<16x128xf32>
    %114 = vector.broadcast %88 : vector<1x128xf32> to vector<16x128xf32>
    %115 = arith.mulf %113, %114 : vector<16x128xf32>
    %116 = vector.broadcast %89 : vector<1x128xf32> to vector<16x128xf32>
    %117 = arith.addf %115, %116 : vector<16x128xf32>
    %118 = arith.truncf %117 : vector<16x128xf32> to vector<16x128xbf16>
    %cst_56 = arith.constant dense<0.000000e+00> : vector<16x256xf32>
    %119 = tpu.matmul %118, %82, %cst_56 {dimension_numbers = #tpu.dot_dimension_numbers<[1], [0], [0], [1], [0, 0, 1, 1], [], []>} : vector<16x128xbf16>, vector<128x256xbf16>, vector<16x256xf32> -> vector<16x256xf32>
    %120 = vector.broadcast %86 : vector<1x256xf32> to vector<16x256xf32>
    %121 = arith.addf %119, %120 : vector<16x256xf32>
    %cst_57 = arith.constant 0.000000e+00 : f32
    %122 = vector.broadcast %cst_57 : f32 to vector<16x256xf32>
    %123 = arith.maximumf %121, %122 : vector<16x256xf32>
    %124 = arith.truncf %123 : vector<16x256xf32> to vector<16x256xbf16>
    %cst_58 = arith.constant dense<0.000000e+00> : vector<16x128xf32>
    %125 = tpu.matmul %124, %84, %cst_58 {dimension_numbers = #tpu.dot_dimension_numbers<[1], [0], [0], [1], [0, 0, 1, 1], [], []>} : vector<16x256xbf16>, vector<256x128xbf16>, vector<16x128xf32> -> vector<16x128xf32>
    %126 = vector.broadcast %87 : vector<1x128xf32> to vector<16x128xf32>
    %127 = arith.addf %125, %126 : vector<16x128xf32>
    %128 = arith.addf %117, %127 : vector<16x128xf32>
    %cst_59 = arith.constant dense<0.000000e+00> : vector<16xf32>
    %129 = vector.multi_reduction <add>, %128, %cst_59 [1] : vector<16x128xf32> to vector<16xf32>
    %130 = vector.shape_cast %129 : vector<16xf32> to vector<16x1xf32>
    %cst_60 = arith.constant 1.280000e+02 : f32
    %131 = vector.broadcast %cst_60 : f32 to vector<16x1xf32>
    %132 = arith.divf %130, %131 : vector<16x1xf32>
    %133 = arith.mulf %128, %128 : vector<16x128xf32>
    %cst_61 = arith.constant dense<0.000000e+00> : vector<16xf32>
    %134 = vector.multi_reduction <add>, %133, %cst_61 [1] : vector<16x128xf32> to vector<16xf32>
    %135 = vector.shape_cast %134 : vector<16xf32> to vector<16x1xf32>
    %cst_62 = arith.constant 1.280000e+02 : f32
    %136 = vector.broadcast %cst_62 : f32 to vector<16x1xf32>
    %137 = arith.divf %135, %136 : vector<16x1xf32>
    %138 = arith.mulf %132, %132 : vector<16x1xf32>
    %139 = arith.subf %137, %138 : vector<16x1xf32>
    %140 = vector.broadcast %132 : vector<16x1xf32> to vector<16x128xf32>
    %141 = arith.subf %128, %140 : vector<16x128xf32>
    %cst_63 = arith.constant 9.99999974E-6 : f32
    %142 = vector.broadcast %cst_63 : f32 to vector<16x1xf32>
    %143 = arith.addf %139, %142 : vector<16x1xf32>
    %144 = math.rsqrt %143 : vector<16x1xf32>
    %145 = vector.broadcast %144 : vector<16x1xf32> to vector<16x128xf32>
    %146 = arith.mulf %141, %145 : vector<16x128xf32>
    %147 = vector.broadcast %90 : vector<1x128xf32> to vector<16x128xf32>
    %148 = arith.mulf %146, %147 : vector<16x128xf32>
    %149 = vector.broadcast %91 : vector<1x128xf32> to vector<16x128xf32>
    %150 = arith.addf %148, %149 : vector<16x128xf32>
    %c2_64 = arith.constant 2 : index
    %c0_65 = arith.constant 0 : index
    %c0_66 = arith.constant 0 : index
    %151 = vector.load %arg3[%c2_64, %c0_65, %c0_66] : memref<3x128x384xbf16, #tpu.memory_space<vmem>>, vector<1x128x128xbf16>
    %152 = vector.shape_cast %151 : vector<1x128x128xbf16> to vector<128x128xbf16>
    %c2_67 = arith.constant 2 : index
    %c0_68 = arith.constant 0 : index
    %c128_69 = arith.constant 128 : index
    %153 = vector.load %arg3[%c2_67, %c0_68, %c128_69] : memref<3x128x384xbf16, #tpu.memory_space<vmem>>, vector<1x128x256xbf16>
    %154 = vector.shape_cast %153 : vector<1x128x256xbf16> to vector<128x256xbf16>
    %c2_70 = arith.constant 2 : index
    %c0_71 = arith.constant 0 : index
    %c0_72 = arith.constant 0 : index
    %155 = vector.load %arg4[%c2_70, %c0_71, %c0_72] : memref<3x256x128xbf16, #tpu.memory_space<vmem>>, vector<1x256x128xbf16>
    %156 = vector.shape_cast %155 : vector<1x256x128xbf16> to vector<256x128xbf16>
    %c16 = arith.constant 16 : index
    %c0_73 = arith.constant 0 : index
    %157 = vector.load %arg5[%c16, %c0_73] : memref<32x256xf32, #tpu.memory_space<vmem>>, vector<1x128xf32>
    %c17 = arith.constant 17 : index
    %c0_74 = arith.constant 0 : index
    %158 = vector.load %arg5[%c17, %c0_74] : memref<32x256xf32, #tpu.memory_space<vmem>>, vector<1x256xf32>
    %c18 = arith.constant 18 : index
    %c0_75 = arith.constant 0 : index
    %159 = vector.load %arg5[%c18, %c0_75] : memref<32x256xf32, #tpu.memory_space<vmem>>, vector<1x128xf32>
    %c19 = arith.constant 19 : index
    %c0_76 = arith.constant 0 : index
    %160 = vector.load %arg5[%c19, %c0_76] : memref<32x256xf32, #tpu.memory_space<vmem>>, vector<1x128xf32>
    %c20 = arith.constant 20 : index
    %c0_77 = arith.constant 0 : index
    %161 = vector.load %arg5[%c20, %c0_77] : memref<32x256xf32, #tpu.memory_space<vmem>>, vector<1x128xf32>
    %c21 = arith.constant 21 : index
    %c0_78 = arith.constant 0 : index
    %162 = vector.load %arg5[%c21, %c0_78] : memref<32x256xf32, #tpu.memory_space<vmem>>, vector<1x128xf32>
    %c22 = arith.constant 22 : index
    %c0_79 = arith.constant 0 : index
    %163 = vector.load %arg5[%c22, %c0_79] : memref<32x256xf32, #tpu.memory_space<vmem>>, vector<1x128xf32>
    %164 = arith.truncf %150 : vector<16x128xf32> to vector<16x128xbf16>
    %cst_80 = arith.constant dense<0.000000e+00> : vector<16x128xf32>
    %165 = tpu.matmul %164, %152, %cst_80 {dimension_numbers = #tpu.dot_dimension_numbers<[1], [0], [0], [1], [0, 0, 1, 1], [], []>} : vector<16x128xbf16>, vector<128x128xbf16>, vector<16x128xf32> -> vector<16x128xf32>
    %166 = vector.broadcast %157 : vector<1x128xf32> to vector<16x128xf32>
    %167 = arith.addf %165, %166 : vector<16x128xf32>
    %cst_81 = arith.constant dense<0.000000e+00> : vector<16xf32>
    %168 = vector.multi_reduction <add>, %167, %cst_81 [1] : vector<16x128xf32> to vector<16xf32>
    %169 = vector.shape_cast %168 : vector<16xf32> to vector<16x1xf32>
    %cst_82 = arith.constant 1.280000e+02 : f32
    %170 = vector.broadcast %cst_82 : f32 to vector<16x1xf32>
    %171 = arith.divf %169, %170 : vector<16x1xf32>
    %172 = arith.mulf %167, %167 : vector<16x128xf32>
    %cst_83 = arith.constant dense<0.000000e+00> : vector<16xf32>
    %173 = vector.multi_reduction <add>, %172, %cst_83 [1] : vector<16x128xf32> to vector<16xf32>
    %174 = vector.shape_cast %173 : vector<16xf32> to vector<16x1xf32>
    %cst_84 = arith.constant 1.280000e+02 : f32
    %175 = vector.broadcast %cst_84 : f32 to vector<16x1xf32>
    %176 = arith.divf %174, %175 : vector<16x1xf32>
    %177 = arith.mulf %171, %171 : vector<16x1xf32>
    %178 = arith.subf %176, %177 : vector<16x1xf32>
    %179 = vector.broadcast %171 : vector<16x1xf32> to vector<16x128xf32>
    %180 = arith.subf %167, %179 : vector<16x128xf32>
    %cst_85 = arith.constant 9.99999974E-6 : f32
    %181 = vector.broadcast %cst_85 : f32 to vector<16x1xf32>
    %182 = arith.addf %178, %181 : vector<16x1xf32>
    %183 = math.rsqrt %182 : vector<16x1xf32>
    %184 = vector.broadcast %183 : vector<16x1xf32> to vector<16x128xf32>
    %185 = arith.mulf %180, %184 : vector<16x128xf32>
    %186 = vector.broadcast %160 : vector<1x128xf32> to vector<16x128xf32>
    %187 = arith.mulf %185, %186 : vector<16x128xf32>
    %188 = vector.broadcast %161 : vector<1x128xf32> to vector<16x128xf32>
    %189 = arith.addf %187, %188 : vector<16x128xf32>
    %190 = arith.truncf %189 : vector<16x128xf32> to vector<16x128xbf16>
    %cst_86 = arith.constant dense<0.000000e+00> : vector<16x256xf32>
    %191 = tpu.matmul %190, %154, %cst_86 {dimension_numbers = #tpu.dot_dimension_numbers<[1], [0], [0], [1], [0, 0, 1, 1], [], []>} : vector<16x128xbf16>, vector<128x256xbf16>, vector<16x256xf32> -> vector<16x256xf32>
    %192 = vector.broadcast %158 : vector<1x256xf32> to vector<16x256xf32>
    %193 = arith.addf %191, %192 : vector<16x256xf32>
    %cst_87 = arith.constant 0.000000e+00 : f32
    %194 = vector.broadcast %cst_87 : f32 to vector<16x256xf32>
    %195 = arith.maximumf %193, %194 : vector<16x256xf32>
    %196 = arith.truncf %195 : vector<16x256xf32> to vector<16x256xbf16>
    %cst_88 = arith.constant dense<0.000000e+00> : vector<16x128xf32>
    %197 = tpu.matmul %196, %156, %cst_88 {dimension_numbers = #tpu.dot_dimension_numbers<[1], [0], [0], [1], [0, 0, 1, 1], [], []>} : vector<16x256xbf16>, vector<256x128xbf16>, vector<16x128xf32> -> vector<16x128xf32>
    %198 = vector.broadcast %159 : vector<1x128xf32> to vector<16x128xf32>
    %199 = arith.addf %197, %198 : vector<16x128xf32>
    %200 = arith.addf %189, %199 : vector<16x128xf32>
    %cst_89 = arith.constant dense<0.000000e+00> : vector<16xf32>
    %201 = vector.multi_reduction <add>, %200, %cst_89 [1] : vector<16x128xf32> to vector<16xf32>
    %202 = vector.shape_cast %201 : vector<16xf32> to vector<16x1xf32>
    %cst_90 = arith.constant 1.280000e+02 : f32
    %203 = vector.broadcast %cst_90 : f32 to vector<16x1xf32>
    %204 = arith.divf %202, %203 : vector<16x1xf32>
    %205 = arith.mulf %200, %200 : vector<16x128xf32>
    %cst_91 = arith.constant dense<0.000000e+00> : vector<16xf32>
    %206 = vector.multi_reduction <add>, %205, %cst_91 [1] : vector<16x128xf32> to vector<16xf32>
    %207 = vector.shape_cast %206 : vector<16xf32> to vector<16x1xf32>
    %cst_92 = arith.constant 1.280000e+02 : f32
    %208 = vector.broadcast %cst_92 : f32 to vector<16x1xf32>
    %209 = arith.divf %207, %208 : vector<16x1xf32>
    %210 = arith.mulf %204, %204 : vector<16x1xf32>
    %211 = arith.subf %209, %210 : vector<16x1xf32>
    %212 = vector.broadcast %204 : vector<16x1xf32> to vector<16x128xf32>
    %213 = arith.subf %200, %212 : vector<16x128xf32>
    %cst_93 = arith.constant 9.99999974E-6 : f32
    %214 = vector.broadcast %cst_93 : f32 to vector<16x1xf32>
    %215 = arith.addf %211, %214 : vector<16x1xf32>
    %216 = math.rsqrt %215 : vector<16x1xf32>
    %217 = vector.broadcast %216 : vector<16x1xf32> to vector<16x128xf32>
    %218 = arith.mulf %213, %217 : vector<16x128xf32>
    %219 = vector.broadcast %162 : vector<1x128xf32> to vector<16x128xf32>
    %220 = arith.mulf %218, %219 : vector<16x128xf32>
    %221 = vector.broadcast %163 : vector<1x128xf32> to vector<16x128xf32>
    %222 = arith.addf %220, %221 : vector<16x128xf32>
    %c32 = arith.constant 32 : index
    %c0_94 = arith.constant 0 : index
    %223 = vector.load %arg2[%c32, %c0_94] : memref<160x128xbf16, #tpu.memory_space<vmem>>, vector<128x128xbf16>
    %c25 = arith.constant 25 : index
    %c0_95 = arith.constant 0 : index
    %224 = vector.load %arg5[%c25, %c0_95] : memref<32x256xf32, #tpu.memory_space<vmem>>, vector<1x128xf32>
    %225 = arith.truncf %222 : vector<16x128xf32> to vector<16x128xbf16>
    %cst_96 = arith.constant dense<0.000000e+00> : vector<16x128xf32>
    %226 = tpu.matmul %225, %223, %cst_96 {dimension_numbers = #tpu.dot_dimension_numbers<[1], [0], [0], [1], [0, 0, 1, 1], [], []>} : vector<16x128xbf16>, vector<128x128xbf16>, vector<16x128xf32> -> vector<16x128xf32>
    %227 = vector.broadcast %224 : vector<1x128xf32> to vector<16x128xf32>
    %228 = arith.addf %226, %227 : vector<16x128xf32>
    %229 = arith.truncf %228 : vector<16x128xf32> to vector<16x128xbf16>
    %c0_97 = arith.constant 0 : index
    %c0_98 = arith.constant 0 : index
    %230 = vector.load %arg6[%c0_97, %c0_98] : memref<16x128xbf16, #tpu.memory_space<vmem>>, vector<16x128xbf16>
    tpu.vector_store %arg6[%c0_97, %c0_98], %229 {strides = array<i32>} : memref<16x128xbf16, #tpu.memory_space<vmem>>, vector<16x128xbf16>,
    return
  }
  func.func @transform_0(%arg0: i32) -> (i32, i32) {
    %c0_i32 = arith.constant 0 : i32
    %c0_i32_0 = arith.constant 0 : i32
    return %arg0, %c0_i32 : i32, i32
  }
  func.func @transform_1(%arg0: i32) -> (i32, i32) {
    %c0_i32 = arith.constant 0 : i32
    %c0_i32_0 = arith.constant 0 : i32
    %c0_i32_1 = arith.constant 0 : i32
    return %c0_i32, %c0_i32_0 : i32, i32
  }
  func.func @transform_2(%arg0: i32) -> (i32, i32, i32) {
    %c0_i32 = arith.constant 0 : i32
    %c0_i32_0 = arith.constant 0 : i32
    %c0_i32_1 = arith.constant 0 : i32
    %c0_i32_2 = arith.constant 0 : i32
    return %c0_i32, %c0_i32_0, %c0_i32_1 : i32, i32, i32
  }
  func.func @transform_3(%arg0: i32) -> (i32, i32, i32) {
    %c0_i32 = arith.constant 0 : i32
    %c0_i32_0 = arith.constant 0 : i32
    %c0_i32_1 = arith.constant 0 : i32
    %c0_i32_2 = arith.constant 0 : i32
    return %c0_i32, %c0_i32_0, %c0_i32_1 : i32, i32, i32
  }
  func.func @transform_4(%arg0: i32) -> (i32, i32) {
    %c0_i32 = arith.constant 0 : i32
    %c0_i32_0 = arith.constant 0 : i32
    %c0_i32_1 = arith.constant 0 : i32
    return %c0_i32, %c0_i32_0 : i32, i32
  }
  func.func @transform_5(%arg0: i32) -> (i32, i32) {
    %c0_i32 = arith.constant 0 : i32
    %c0_i32_0 = arith.constant 0 : i32
    return %arg0, %c0_i32 : i32, i32
  }
}

</mosaic_0001>

<bundles_post_ra>
// kernel: transformer_forward.1
= control target key start
LH: loop header
LB: loop body
LE: loop exit
PB: predicated region body
PF: predicated region fallthrough
CT: control target
= control target key end

     0   :  { %10 = vsyncpa [#allocation3], 0  ;;  %s2543_s0 = inlined_call_operand.vmem [shape: f32[16,32], index: 0, kind: input, shape index: {}]   ;;  %s2544_s1 = inlined_call_operand.hbm [shape: bf16[160,128], index: 1, kind: input, shape index: {}]   ;;  %s2545_s2 = inlined_call_operand.hbm [shape: bf16[3,128,384], index: 2, kind: input, shape index: {}]   ;;  %s2546_s3 = inlined_call_operand.hbm [shape: bf16[3,256,128], index: 3, kind: input, shape index: {}]   ;;  %s2547_s4 = inlined_call_operand.hbm [shape: f32[32,256], index: 4, kind: input, shape index: {}]   ;;  %s2548_s5 = inlined_call_operand.vmem [shape: bf16[16,128], index: 5, kind: output, shape index: {}]  }
   0x1   :  { %11 = vsyncpa [#allocation5], 0 }
   0x2   :  { %12 = vsyncpa [#allocation8], 0  ;;  %s2386_s18 = smov [#allocation4]  }
   0x3   :  { %s32_s19 = sshll.u32 %s2386_s18, 4  ;;  %s33_s19 = int_to_ptr.vmem [resolvable:$true] %s32_s19 }
   0x4   :  { %s2308_s20 = scalar_lea.vmem %s33_s19, 9216  ;;  %p2313_p1 = scmp.lt.s32.totalorder %s33_s19, %s33_s19 }
   0x5   :  { %p2309_p0 = scmp.ne.s32.totalorder %s33_s19, %s2308_s20  ;;  %p2314_p2 = scmp.lt.s32.totalorder %s2308_s20, %s2308_s20 }
   0x7   :  { %p2315_p3 = por %p2314_p2, %p2313_p1 }
   0x9   :  { %p2316_p4 = pnand %p2315_p3, %p2309_p0 }
   0xb   :  { %2319 = shalt.err (!%p2316_p4)
}
   0xc   :  { %s2387_s21 = smov 192   ;;  %s2388_s22 = smov 12  }
   0xd   :  { %38 = dma.hbm_to_vmem [thread:$0]  %s2545_s2, 9216, %s33_s19, [#allocation5], %s2387_s21, %s2387_s21, %s2388_s22  }
   0xe   :  { %s2389_s25 = smov [#allocation2]  }
   0xf   :  { %s20_s26 = sshll.u32 %s2389_s25, 4  ;;  %s21_s26 = int_to_ptr.vmem [resolvable:$true] %s20_s26 }
  0x10   :  { %s2328_s27 = scalar_lea.vmem %s21_s26, 1280  ;;  %p2333_p6 = scmp.lt.s32.totalorder %s21_s26, %s21_s26 }
  0x11   :  { %p2329_p5 = scmp.ne.s32.totalorder %s21_s26, %s2328_s27  ;;  %p2334_p7 = scmp.lt.s32.totalorder %s2328_s27, %s2328_s27 }
  0x13   :  { %p2335_p8 = por %p2334_p7, %p2333_p6 }
  0x15   :  { %p2336_p9 = pnand %p2335_p8, %p2329_p5 }
  0x17   :  { %2339 = shalt.err (!%p2336_p9)
}
  0x18   :  { %s2390_s28 = smov 64   ;;  %s2391_s29 = smov 4  }
  0x19   :  { %26 = dma.hbm_to_vmem [thread:$0]  %s2544_s1, 1280, %s21_s26, [#allocation3], %s2390_s28, %s2390_s28, %s2391_s29  }
  0x1a   :  { %s2392_s7 = smov [#allocation6]   ;;  %s2393_s9 = smov [#allocation7]  }
  0x1b   :  { %s44_s8 = sshll.u32 %s2392_s7, 4  ;;  %s56_s2 = sshll.u32 %s2393_s9, 4  ;;  %s45_s8 = int_to_ptr.vmem [resolvable:$true] %s44_s8  ;;  %s57_s2 = int_to_ptr.vmem [resolvable:$true] %s56_s2 }
  0x1c   :  { %s2348_s10 = scalar_lea.vmem %s45_s8, 6144  ;;  %p2353_p11 = scmp.lt.s32.totalorder %s45_s8, %s45_s8 }
  0x1d   :  { %p2349_p10 = scmp.ne.s32.totalorder %s45_s8, %s2348_s10  ;;  %p2354_p12 = scmp.lt.s32.totalorder %s2348_s10, %s2348_s10 }
  0x1f   :  { %p2355_p13 = por %p2354_p12, %p2353_p11 }
  0x21   :  { %p2356_p0 = pnand %p2355_p13, %p2349_p10 }
  0x23   :  { %2359 = shalt.err (!%p2356_p0)
}
  0x24   :  { %50 = dma.hbm_to_vmem [thread:$0]  %s2546_s3, 6144, %s45_s8, [#allocation5], %s2390_s28, %s2390_s28, %s2391_s29  }
  0x25   :  { %s2368_s13 = scalar_lea.vmem %s57_s2, 1024  ;;  %p2373_p2 = scmp.lt.s32.totalorder %s57_s2, %s57_s2 }
  0x26   :  { %p2369_p1 = scmp.ne.s32.totalorder %s57_s2, %s2368_s13  ;;  %p2374_p3 = scmp.lt.s32.totalorder %s2368_s13, %s2368_s13 }
  0x28   :  { %p2375_p4 = por %p2374_p3, %p2373_p2 }
  0x2a   :  { %p2376_p5 = pnand %p2375_p4, %p2369_p1 }
  0x2c   :  { %2379 = shalt.err (!%p2376_p5)
}
  0x2d   :  { %s2394_s1 = smov 256   ;;  %s2395_s14 = smov 16  }
  0x2e   :  { %62 = dma.hbm_to_vmem [thread:$0]  %s2547_s4, 1024, %s57_s2, [#allocation8], %s2394_s1, %s2394_s1, %s2395_s14  }
  0x2f   :  { %2380 = dma.done.wait [#allocation3], 1280  }
  0x30   :  { %2381 = vsyncadd [#allocation3], 4294966016 }
  0x31   :  { %2382 = dma.done.wait [#allocation5], 15360  }
  0x32   :  { %2383 = vsyncadd [#allocation5], 4294951936 }
  0x33   :  { %2384 = dma.done.wait [#allocation8], 1024  }
  0x34   :  { %2385 = vsyncadd [#allocation8], 4294966272  ;;  %v2396_v0 = vmov 0.0   ;;  %vm2397_vm0 = vmmov 0   ;;  %v2122_v1 = vld [vmem:[#allocation2 + $0x8] sm:$0xff]   ;;  %v2123_v2 = vld [vmem:[#allocation2] sm:$0xff]  }
  0x35   :  { %2021 = vmatprep.subr.bf16.mxu0 %v2396_v0  ;;  %2025 = vmatprep.mubr.msk.bf16.mxu0 %vm2397_vm0, %v2396_v0  ;;  %v81_v3 = vld [vmem:[%s2543_s0] sm:$0xff]  ;;  %v82_v4 = vld [vmem:[%s2543_s0 + $0x8] sm:$0xff]  ;;  %vm96_vm1 = vcmask 261120   ;;  %v2127_v9 = vld [vmem:[#allocation4 + $0x60] ss:$12 sps:$4 sm:$0xff]   ;;  %v2398_v42 = vmov 0  }
  0x36   :  { %2029 = vmatprep.subr.bf16.mxu1 %v2396_v0  ;;  %2045 = vmatprep.mubr.msk.bf16.mxu1 %vm2397_vm0, %v2396_v0  ;;  %v2124_v5 = vld [vmem:[#allocation4 + $0xa8] ss:$12 sps:$4 sm:$0xff]   ;;  %v83_v6 = vpack.c.bf16 %v82_v4, %v81_v3  ;;  %v2125_v7 = vld [vmem:[#allocation4 + $0x90] ss:$12 sps:$4 sm:$0xff]   ;;  %v2126_v8 = vld [vmem:[#allocation4 + $0x78] ss:$12 sps:$4 sm:$0xff]  }
  0x37   :  { %2022 = vmatpush3.bf16.msra.mxu0 %v2122_v1  ;;  %2030 = vmatpush3.bf16.msra.mxu1 %v2124_v5  ;;  %v2128_v10 = vld [vmem:[#allocation4 + $0x48] ss:$12 sps:$4 sm:$0xff]   ;;  %v2129_v11 = vld [vmem:[#allocation4 + $0x30] ss:$12 sps:$4 sm:$0xff]   ;;  %v2130_v12 = vld [vmem:[#allocation4 + $0x18] ss:$12 sps:$4 sm:$0xff]  }
  0x38   :  { %2023 = vmatprep.subr.bf16.mxu0 %v2396_v0  ;;  %2031 = vmatprep.subr.bf16.mxu1 %v2396_v0  ;;  %v2131_v13 = vld [vmem:[#allocation4] ss:$12 sps:$4 sm:$0xff]   ;;  %v80_v15 = vld [vmem:[#allocation7 + $0x30] ss:$0 sm:$0xff]  ;;  %v2137_v33 = vld [vmem:[#allocation4 + $0x98] ss:$12 sps:$4 sm:$0xff]  }
  0x39   :  { %v205_v22 = vld [vmem:[#allocation7] ss:$0 sm:$0xff]  ;;  %v2134_v31 = vld [vmem:[#allocation4 + $0xb0] ss:$12 sps:$4 sm:$0xff]   ;;  %v2132_v32 = vld [vmem:[#allocation4 + $0xac] ss:$12 sps:$4 sm:$0xff]  }
  0x3a   :  { %v2135_v34 = vld [vmem:[#allocation4 + $0x94] ss:$12 sps:$4 sm:$0xff]   ;;  %v2138_v36 = vld [vmem:[#allocation4 + $0x7c] ss:$12 sps:$4 sm:$0xff]   ;;  %v2141_v37 = vld [vmem:[#allocation4 + $0x64] ss:$12 sps:$4 sm:$0xff]  }
  0x3b   :  { %2024 = vmatpush3.bf16.msra.mxu0 %v2123_v2  ;;  %2032 = vmatpush3.bf16.msra.mxu1 %v2125_v7  ;;  %v2140_v35 = vld [vmem:[#allocation4 + $0x80] ss:$12 sps:$4 sm:$0xff]   ;;  %v2143_v38 = vld [vmem:[#allocation4 + $0x68] ss:$12 sps:$4 sm:$0xff]   ;;  %v2146_v39 = vld [vmem:[#allocation4 + $0x50] ss:$12 sps:$4 sm:$0xff]  }
  0x3c   :  { %2033 = vmatprep.subr.bf16.mxu1 %v2396_v0  ;;  %426 = vmatprep.subr.bf16.mxu0 %v2134_v31  ;;  %v2144_v40 = vld [vmem:[#allocation4 + $0x4c] ss:$12 sps:$4 sm:$0xff]   ;;  %v2147_v43 = vld [vmem:[#allocation4 + $0x34] ss:$12 sps:$4 sm:$0xff]   ;;  %v2150_v45 = vld [vmem:[#allocation4 + $0x1c] ss:$12 sps:$4 sm:$0xff]  }
  0x3d   :  { %v2149_v41 = vld [vmem:[#allocation4 + $0x38] ss:$12 sps:$4 sm:$0xff]   ;;  %v2152_v44 = vld [vmem:[#allocation4 + $0x20] ss:$12 sps:$4 sm:$0xff]   ;;  %v2155_v46 = vld [vmem:[#allocation4 + $0x8] ss:$12 sps:$4 sm:$0xff]  }
  0x3e   :  { %2026 = vmatmul.mubr.msk.bf16.vlgmr.msra.gmra.mxu0 %vm96_vm1, %v83_v6  ;;  %v2153_v47 = vld [vmem:[#allocation4 + $0x4] ss:$12 sps:$4 sm:$0xff]   ;;  %v2156_v48 = vld [vmem:[#allocation6 + $0x78] sm:$0xff]   ;;  %v2160_v52 = vld [vmem:[#allocation6 + $0x68] sm:$0xff]  }
  0x3f   :  { %2034 = vmatpush3.bf16.msra.mxu1 %v2126_v8  ;;  %427 = vmatpush1.bf16.msra.mxu0 %v2132_v32  ;;  %v2157_v49 = vld [vmem:[#allocation6 + $0x38] sm:$0xff]   ;;  %v2158_v50 = vld [vmem:[#allocation6 + $0x70] sm:$0xff]   ;;  %v2161_v53 = vld [vmem:[#allocation6 + $0x28] sm:$0xff]  }
  0x40   :  { %2035 = vmatprep.subr.bf16.mxu1 %v2396_v0  ;;  %428 = vmatprep.subr.bf16.mxu0 %v2137_v33  ;;  %v2159_v51 = vld [vmem:[#allocation6 + $0x30] sm:$0xff]   ;;  %v2162_v54 = vld [vmem:[#allocation6 + $0x60] sm:$0xff]   ;;  %v2164_v56 = vld [vmem:[#allocation6 + $0x58] sm:$0xff]  }
  0x41   :  { %458 = vmatprep.mubr.bf16.mxu0 %v2398_v42  ;;  %v2163_v55 = vld [vmem:[#allocation6 + $0x20] sm:$0xff]   ;;  %v2165_v57 = vld [vmem:[#allocation6 + $0x18] sm:$0xff]  }
  0x42   :  { %v207_v32 = vld [vmem:[#allocation7 + $0x1] ss:$8 sm:$0x3] }
  0x43   :  { %2036 = vmatpush3.bf16.msra.mxu1 %v2127_v9  ;;  %429 = vmatpush1.bf16.msra.mxu0 %v2135_v34 }
  0x44   :  { %2037 = vmatprep.subr.bf16.mxu1 %v2396_v0  ;;  %430 = vmatprep.subr.bf16.mxu0 %v2140_v35 }
  0x47   :  { %2038 = vmatpush3.bf16.msra.mxu1 %v2128_v10  ;;  %431 = vmatpush1.bf16.msra.mxu0 %v2138_v36 }
  0x48   :  { %2039 = vmatprep.subr.bf16.mxu1 %v2396_v0  ;;  %432 = vmatprep.subr.bf16.mxu0 %v2143_v38 }
  0x4b   :  { %2040 = vmatpush3.bf16.msra.mxu1 %v2129_v11  ;;  %433 = vmatpush1.bf16.msra.mxu0 %v2141_v37 }
  0x4c   :  { %2041 = vmatprep.subr.bf16.mxu1 %v2396_v0  ;;  %434 = vmatprep.subr.bf16.mxu0 %v2146_v39 }
  0x4f   :  { %2042 = vmatpush3.bf16.msra.mxu1 %v2130_v12  ;;  %435 = vmatpush1.bf16.msra.mxu0 %v2144_v40  ;;  %v209_v12 = vld [vmem:[#allocation7 + $0x3] ss:$0 sm:$0xff] }
  0x50   :  { %2043 = vmatprep.subr.bf16.mxu1 %v2396_v0  ;;  %436 = vmatprep.subr.bf16.mxu0 %v2149_v41 }
  0x53   :  { %2044 = vmatpush3.bf16.msra.mxu1 %v2131_v13  ;;  %437 = vmatpush1.bf16.msra.mxu0 %v2147_v43 }
  0x54   :  { %438 = vmatprep.subr.bf16.mxu0 %v2152_v44  ;;  %1928 = vmatprep.subr.bf16.mxu1 %v2156_v48 }
  0x57   :  { %439 = vmatpush1.bf16.msra.mxu0 %v2150_v45 }
  0x58   :  { %440 = vmatprep.subr.bf16.mxu0 %v2155_v46 }
  0x5b   :  { %441 = vmatpush1.bf16.msra.mxu0 %v2153_v47 }
  0x5c   :  { %2049 = vmatprep.subr.bf16.mxu0 %v2396_v0 }
  0xfe   :  { %v134_v14 = vpop.f32.mrf.mxu0 }
  0xff   :  { %v135_v18 = vadd.f32 %v134_v14, %v80_v15 }
 0x100   :  { %v2027_v16 = vpop.f32.mrf.mxu0 }
 0x102   :  { %v137_v17 = vpop.f32.mrf.mxu0 }
 0x103   :  { %v138_v19 = vadd.f32 %v137_v17, %v80_v15  ;;  %v210_v17 = vld [vmem:[#allocation7 + $0x4] ss:$0 sm:$0xff] }
 0x104   :  { %v2028_v20 = vpop.f32.mrf.mxu0 }
 0x105   :  { %v213_v21 = vpack.c.bf16 %v138_v19, %v135_v18 }
 0x107   :  { %2046 = vmatmul.mubr.bf16.vlgmr.msra.gmra.mxu1 %v213_v21 }
 0x108   :  { %1929 = vmatpush3.bf16.msra.mxu1 %v2157_v49 }
 0x109   :  { %1930 = vmatprep.subr.bf16.mxu1 %v2158_v50 }
 0x10c   :  { %1931 = vmatpush3.bf16.msra.mxu1 %v2159_v51  ;;  %v208_v51 = vld [vmem:[#allocation7 + $0x2] ss:$0 sm:$0xff] }
 0x10d   :  { %1932 = vmatprep.subr.bf16.mxu1 %v2160_v52 }
 0x110   :  { %1933 = vmatpush3.bf16.msra.mxu1 %v2161_v53 }
 0x111   :  { %1934 = vmatprep.subr.bf16.mxu1 %v2162_v54 }
 0x114   :  { %1935 = vmatpush3.bf16.msra.mxu1 %v2163_v55 }
 0x115   :  { %1936 = vmatprep.subr.bf16.mxu1 %v2164_v56 }
 0x118   :  { %1937 = vmatpush3.bf16.msra.mxu1 %v2165_v57 }
 0x1c7   :  { %v296_v23 = vpop.f32.mrf.mxu1 }
 0x1c8   :  { %v2461_v24 = vadd.f32 %v296_v23, %v205_v22  ;;  %v2167_v23 = vld [vmem:[#allocation6 + $0x10] sm:$0xff]  }
 0x1c9   :  { %v2047_v25 = vpop.f32.mrf.mxu1 }
 0x1ca   :  { %303 = vadd.xlane.f32.xlu0 %v2461_v24  ;;  %v310_v26 = vmul.f32 %v2461_v24, %v2461_v24  ;;  %v2169_v25 = vld [vmem:[#allocation6 + $0x8] sm:$0xff]  }
 0x1cb   :  { %v299_v27 = vpop.f32.mrf.mxu1 }
 0x1cc   :  { %v2466_v28 = vadd.f32 %v299_v27, %v205_v22  ;;  %312 = vadd.xlane.f32.xlu1 %v310_v26  ;;  %v2166_v22 = vld [vmem:[#allocation6 + $0x50] sm:$0xff]   ;;  %v2170_v26 = vld [vmem:[#allocation6 + $0x40] sm:$0xff]  }
 0x1cd   :  { %v2048_v29 = vpop.f32.mrf.mxu1  ;;  %1938 = vmatprep.subr.bf16.mxu1 %v2166_v22  ;;  %v2171_v27 = vld [vmem:[#allocation6] sm:$0xff]  }
 0x1ce   :  { %305 = vadd.xlane.f32.xlu0 %v2466_v28  ;;  %v311_v30 = vmul.f32 %v2466_v28, %v2466_v28  ;;  %1939 = vmatpush3.bf16.msra.mxu1 %v2167_v23 }
 0x1d0   :  { %314 = vadd.xlane.f32.xlu1 %v311_v30 }
 0x253   :  { %v304_v58 = vpop.xlane.xlu0 %303 }
 0x254   :  { %v308_v59 = vmul.f32 0.0078125, %v304_v58 }
 0x255   :  { %v313_v60 = vpop.xlane.xlu1 %312 }
 0x256   :  { %v318_v61 = vmul.f32 %v308_v59, %v308_v59  ;;  %v316_v62 = vmul.f32 0.0078125, %v313_v60  ;;  %v322_v9 = vsub.f32 %v2461_v24, %v308_v59  ;;  %v2168_v24 = vld [vmem:[#allocation6 + $0x48] sm:$0xff]  }
 0x257   :  { %v306_v63 = vpop.xlane.xlu0 %305  ;;  %1940 = vmatprep.subr.bf16.mxu1 %v2168_v24 }
 0x258   :  { %v320_v1 = vsub.f32 %v316_v62, %v318_v61  ;;  %v309_v2 = vmul.f32 0.0078125, %v306_v63  ;;  %1941 = vmatpush3.bf16.msra.mxu1 %v2169_v25  ;;  %v2172_v63 = vld [vmem:[#allocation4 + $0x168] ss:$12 sps:$4 sm:$0xff]   ;;  %v211_v25 = vld [vmem:[#allocation7 + $0x5] ss:$0 sm:$0xff] }
 0x259   :  { %v315_v3 = vpop.xlane.xlu1 %314  ;;  %1942 = vmatprep.subr.bf16.mxu1 %v2170_v26 }
 0x25a   :  { %v324_v4 = vadd.f32 1e-05, %v320_v1  ;;  %v319_v5 = vmul.f32 %v309_v2, %v309_v2  ;;  %v317_v6 = vmul.f32 0.0078125, %v315_v3  ;;  %v323_v13 = vsub.f32 %v2466_v28, %v309_v2  ;;  %v2173_v1 = vld [vmem:[#allocation4 + $0x150] ss:$12 sps:$4 sm:$0xff]  }
 0x25b   :  { %v336_v28 = vlaneseq  ;;  %v2174_v2 = vld [vmem:[#allocation4 + $0x138] ss:$12 sps:$4 sm:$0xff]   ;;  %v2175_v3 = vld [vmem:[#allocation4 + $0x120] ss:$12 sps:$4 sm:$0xff]  }
 0x25c   :  { %2276 = vrsqrt.f32 %v324_v4  ;;  %v321_v7 = vsub.f32 %v317_v6, %v319_v5  ;;  %1943 = vmatpush3.bf16.msra.mxu1 %v2171_v27  ;;  %v2176_v4 = vld [vmem:[#allocation4 + $0x108] ss:$12 sps:$4 sm:$0xff]   ;;  %v2177_v5 = vld [vmem:[#allocation4 + $0xf0] ss:$12 sps:$4 sm:$0xff]   ;;  %v2178_v6 = vld [vmem:[#allocation4 + $0xd8] ss:$12 sps:$4 sm:$0xff]  }
 0x25d   :  { %v337_v29 = vshrl.u32 %v336_v28, 7 }
 0x25e   :  { %v325_v8 = vadd.f32 1e-05, %v321_v7  ;;  %v2179_v7 = vld [vmem:[#allocation4 + $0xc0] ss:$12 sps:$4 sm:$0xff]  }
 0x25f   :  { %v2477_v30 = vsub.s32 1, %v337_v29  ;;  %v2479_v31 = vsub.s32 0, %v337_v29 }
 0x260   :  { %2278 = vrsqrt.f32 %v325_v8 }
 0x261   :  { %v343_v34 = vrot.slane %v207_v32, %v2477_v30  ;;  %v339_v35 = vrot.slane %v207_v32, %v2479_v31  ;;  %v212_v32 = vld [vmem:[#allocation7 + $0x6] ss:$0 sm:$0xff] }
 0x269   :  { %v2277_v10 = vpop.eup %2276 }
 0x26a   :  { %v328_v11 = vmul.f32 %v2277_v10, %v322_v9 }
 0x26c   :  { %v330_v16 = vmul.f32 %v328_v11, %v209_v12 }
 0x26d   :  { %v2279_v14 = vpop.eup %2278 }
 0x26e   :  { %v329_v15 = vmul.f32 %v2279_v14, %v323_v13  ;;  %v332_v19 = vadd.f32 %v330_v16, %v210_v17 }
 0x270   :  { %v331_v18 = vmul.f32 %v329_v15, %v209_v12 }
 0x272   :  { %v333_v20 = vadd.f32 %v331_v18, %v210_v17 }
 0x274   :  { %v334_v21 = vpack.c.bf16 %v333_v20, %v332_v19 }
 0x276   :  { %459 = vmatmul.mubr.bf16.vlgmr.msra.gmra.mxu0 %v334_v21 }
 0x277   :  { %2065 = vmatprep.mubr.msk.bf16.mxu0 %vm2397_vm0, %v2396_v0  ;;  %2050 = vmatpush3.bf16.msra.mxu0 %v2172_v63  ;;  %v2204_v63 = vld [vmem:[#allocation6 + $0xf8] sm:$0xff]  }
 0x278   :  { %2051 = vmatprep.subr.bf16.mxu0 %v2396_v0 }
 0x27b   :  { %2052 = vmatpush3.bf16.msra.mxu0 %v2173_v1  ;;  %v2205_v1 = vld [vmem:[#allocation6 + $0xb8] sm:$0xff]  }
 0x27c   :  { %2053 = vmatprep.subr.bf16.mxu0 %v2396_v0 }
 0x27f   :  { %2054 = vmatpush3.bf16.msra.mxu0 %v2174_v2  ;;  %v2206_v2 = vld [vmem:[#allocation6 + $0xf0] sm:$0xff]  }
 0x280   :  { %2055 = vmatprep.subr.bf16.mxu0 %v2396_v0 }
 0x283   :  { %2056 = vmatpush3.bf16.msra.mxu0 %v2175_v3  ;;  %v2207_v3 = vld [vmem:[#allocation6 + $0xb0] sm:$0xff]  }
 0x284   :  { %2057 = vmatprep.subr.bf16.mxu0 %v2396_v0 }
 0x287   :  { %2058 = vmatpush3.bf16.msra.mxu0 %v2176_v4  ;;  %v2208_v4 = vld [vmem:[#allocation6 + $0xe8] sm:$0xff]  }
 0x288   :  { %2059 = vmatprep.subr.bf16.mxu0 %v2396_v0 }
 0x28b   :  { %2060 = vmatpush3.bf16.msra.mxu0 %v2177_v5  ;;  %v2209_v5 = vld [vmem:[#allocation6 + $0xa8] sm:$0xff]  }
 0x28c   :  { %2061 = vmatprep.subr.bf16.mxu0 %v2396_v0 }
 0x28f   :  { %2062 = vmatpush3.bf16.msra.mxu0 %v2178_v6  ;;  %v2210_v6 = vld [vmem:[#allocation6 + $0xe0] sm:$0xff]  }
 0x290   :  { %2063 = vmatprep.subr.bf16.mxu0 %v2396_v0 }
 0x293   :  { %2064 = vmatpush3.bf16.msra.mxu0 %v2179_v7  ;;  %v2211_v7 = vld [vmem:[#allocation6 + $0xa0] sm:$0xff]  }
 0x294   :  { %1959 = vmatprep.subr.bf16.mxu0 %v2204_v63 }
 0x336   :  { %v460_v33 = vpop.f32.mrf.mxu0 }
 0x337   :  { %v461_v40 = vadd.f32 %v460_v33, %v339_v35 }
 0x338   :  { %v462_v36 = vpop.f32.mrf.mxu0 }
 0x339   :  { %v463_v38 = vadd.f32 %v462_v36, %v343_v34  ;;  %v469_v47 = vmax.f32 %v461_v40, 0.0 }
 0x33a   :  { %v464_v37 = vpop.f32.mrf.mxu0 }
 0x33b   :  { %v465_v39 = vadd.f32 %v464_v37, %v339_v35  ;;  %v470_v45 = vmax.f32 %v463_v38, 0.0  ;;  %v710_v37 = vld [vmem:[#allocation7 + $0x10] ss:$0 sm:$0xff] }
 0x33c   :  { %v466_v41 = vpop.f32.mrf.mxu0 }
 0x33d   :  { %v467_v43 = vadd.f32 %v466_v41, %v343_v34  ;;  %v471_v44 = vmax.f32 %v465_v39, 0.0 }
 0x33f   :  { %v472_v46 = vmax.f32 %v467_v43, 0.0  ;;  %v473_v49 = vpack.c.bf16 %v471_v44, %v469_v47  ;;  %v2182_v47 = vld [vmem:[#allocation4 + $0x170] ss:$12 sps:$4 sm:$0xff]  }
 0x340   :  { %930 = vmatprep.subr.bf16.mxu1 %v2182_v47 }
 0x341   :  { %v474_v48 = vpack.c.bf16 %v472_v46, %v470_v45 }
 0x343   :  { %603 = vmatprep.mubr.bf16.mxu1 %v474_v48  ;;  %v2180_v48 = vld [vmem:[#allocation4 + $0x16c] ss:$12 sps:$4 sm:$0xff]  }
 0x344   :  { %604 = vmatmul.mubr.bf16.vlgmr.msra.gmra.mxu1 %v473_v49  ;;  %v2185_v49 = vld [vmem:[#allocation4 + $0x158] ss:$12 sps:$4 sm:$0xff]  }
 0x345   :  { %962 = vmatprep.mubr.bf16.mxu1 %v2398_v42  ;;  %931 = vmatpush1.bf16.msra.mxu1 %v2180_v48 }
 0x346   :  { %932 = vmatprep.subr.bf16.mxu1 %v2185_v49 }
 0x404   :  { %v1944_v50 = vpop.f32.mrf.mxu1 }
 0x406   :  { %v1945_v52 = vpop.f32.mrf.mxu1 }
 0x407   :  { %v1946_v53 = vadd.f32 %v1945_v52, %v1944_v50  ;;  %v2183_v50 = vld [vmem:[#allocation4 + $0x154] ss:$12 sps:$4 sm:$0xff]   ;;  %v2186_v52 = vld [vmem:[#allocation4 + $0x13c] ss:$12 sps:$4 sm:$0xff]  }
 0x408   :  { %v1947_v54 = vpop.f32.mrf.mxu1  ;;  %933 = vmatpush1.bf16.msra.mxu1 %v2183_v50 }
 0x409   :  { %v606_v55 = vadd.f32 %v1946_v53, %v208_v51  ;;  %v2189_v53 = vld [vmem:[#allocation4 + $0x124] ss:$12 sps:$4 sm:$0xff]  }
 0x40a   :  { %v1948_v56 = vpop.f32.mrf.mxu1 }
 0x40b   :  { %v1949_v57 = vadd.f32 %v1948_v56, %v1947_v54  ;;  %v612_v58 = vadd.f32 %v606_v55, %v332_v19  ;;  %v2191_v54 = vld [vmem:[#allocation4 + $0x128] ss:$12 sps:$4 sm:$0xff]   ;;  %v2194_v55 = vld [vmem:[#allocation4 + $0x110] ss:$12 sps:$4 sm:$0xff]   ;;  %v2192_v56 = vld [vmem:[#allocation4 + $0x10c] ss:$12 sps:$4 sm:$0xff]  }
 0x40d   :  { %v609_v59 = vadd.f32 %v1949_v57, %v208_v51  ;;  %614 = vadd.xlane.f32.xlu0 %v612_v58  ;;  %v620_v61 = vmul.f32 %v612_v58, %v612_v58  ;;  %v2188_v51 = vld [vmem:[#allocation4 + $0x140] ss:$12 sps:$4 sm:$0xff]   ;;  %v2197_v57 = vld [vmem:[#allocation4 + $0xf8] ss:$12 sps:$4 sm:$0xff]  }
 0x40e   :  { %934 = vmatprep.subr.bf16.mxu1 %v2188_v51 }
 0x40f   :  { %v613_v60 = vadd.f32 %v609_v59, %v333_v20  ;;  %935 = vmatpush1.bf16.msra.mxu1 %v2186_v52  ;;  %v2200_v59 = vld [vmem:[#allocation4 + $0xe0] ss:$12 sps:$4 sm:$0xff]  }
 0x410   :  { %936 = vmatprep.subr.bf16.mxu1 %v2191_v54 }
 0x411   :  { %616 = vadd.xlane.f32.xlu1 %v613_v60  ;;  %622 = vadd.xlane.f32.xlu0 %v620_v61  ;;  %v621_v62 = vmul.f32 %v613_v60, %v613_v60  ;;  %v2203_v61 = vld [vmem:[#allocation4 + $0xc8] ss:$12 sps:$4 sm:$0xff]  }
 0x413   :  { %937 = vmatpush1.bf16.msra.mxu1 %v2189_v53 }
 0x414   :  { %938 = vmatprep.subr.bf16.mxu1 %v2194_v55 }
 0x415   :  { %624 = vadd.xlane.f32.xlu1 %v621_v62  ;;  %v2201_v62 = vld [vmem:[#allocation4 + $0xc4] ss:$12 sps:$4 sm:$0xff]  }
 0x417   :  { %939 = vmatpush1.bf16.msra.mxu1 %v2192_v56 }
 0x418   :  { %940 = vmatprep.subr.bf16.mxu1 %v2197_v57 }
 0x496   :  { %v615_v8 = vpop.xlane.xlu0 %614 }
 0x497   :  { %v618_v9 = vmul.f32 0.0078125, %v615_v8  ;;  %v2212_v8 = vld [vmem:[#allocation6 + $0xd8] sm:$0xff]  }
 0x499   :  { %v628_v12 = vmul.f32 %v618_v9, %v618_v9  ;;  %v632_v22 = vsub.f32 %v612_v58, %v618_v9  ;;  %v2195_v58 = vld [vmem:[#allocation4 + $0xf4] ss:$12 sps:$4 sm:$0xff]   ;;  %v2213_v9 = vld [vmem:[#allocation6 + $0x98] sm:$0xff]  }
 0x49a   :  { %v617_v10 = vpop.xlane.xlu1 %616  ;;  %v623_v11 = vpop.xlane.xlu0 %622  ;;  %941 = vmatpush1.bf16.msra.mxu1 %v2195_v58 }
 0x49b   :  { %v619_v13 = vmul.f32 0.0078125, %v617_v10  ;;  %v626_v14 = vmul.f32 0.0078125, %v623_v11  ;;  %942 = vmatprep.subr.bf16.mxu1 %v2200_v59 }
 0x49d   :  { %v630_v15 = vsub.f32 %v626_v14, %v628_v12  ;;  %v629_v17 = vmul.f32 %v619_v13, %v619_v13  ;;  %v633_v26 = vsub.f32 %v613_v60, %v619_v13  ;;  %v2198_v60 = vld [vmem:[#allocation4 + $0xdc] ss:$12 sps:$4 sm:$0xff]  }
 0x49e   :  { %v625_v16 = vpop.xlane.xlu1 %624  ;;  %943 = vmatpush1.bf16.msra.mxu1 %v2198_v60 }
 0x49f   :  { %v634_v18 = vadd.f32 1e-05, %v630_v15  ;;  %v627_v19 = vmul.f32 0.0078125, %v625_v16  ;;  %944 = vmatprep.subr.bf16.mxu1 %v2203_v61 }
 0x4a1   :  { %2280 = vrsqrt.f32 %v634_v18  ;;  %v631_v20 = vsub.f32 %v627_v19, %v629_v17 }
 0x4a2   :  { %945 = vmatpush1.bf16.msra.mxu1 %v2201_v62 }
 0x4a3   :  { %v635_v21 = vadd.f32 1e-05, %v631_v20  ;;  %2069 = vmatprep.subr.bf16.mxu1 %v2396_v0 }
 0x4a5   :  { %2282 = vrsqrt.f32 %v635_v21 }
 0x4ae   :  { %v2281_v23 = vpop.eup %2280 }
 0x4af   :  { %v638_v24 = vmul.f32 %v2281_v23, %v632_v22 }
 0x4b1   :  { %v640_v29 = vmul.f32 %v638_v24, %v211_v25 }
 0x4b2   :  { %v2283_v27 = vpop.eup %2282 }
 0x4b3   :  { %v639_v28 = vmul.f32 %v2283_v27, %v633_v26  ;;  %v642_v34 = vadd.f32 %v640_v29, %v212_v32  ;;  %v714_v27 = vld [vmem:[#allocation7 + $0x13] ss:$0 sm:$0xff] }
 0x4b5   :  { %v641_v33 = vmul.f32 %v639_v28, %v211_v25 }
 0x4b7   :  { %v643_v35 = vadd.f32 %v641_v33, %v212_v32 }
 0x4b9   :  { %v718_v36 = vpack.c.bf16 %v643_v35, %v642_v34  ;;  %v715_v34 = vld [vmem:[#allocation7 + $0x14] ss:$0 sm:$0xff] }
 0x4bb   :  { %2066 = vmatmul.mubr.bf16.vlgmr.msra.gmra.mxu0 %v718_v36 }
 0x4bc   :  { %1960 = vmatpush3.bf16.msra.mxu0 %v2205_v1  ;;  %v713_v1 = vld [vmem:[#allocation7 + $0x12] ss:$0 sm:$0xff] }
 0x4bd   :  { %1961 = vmatprep.subr.bf16.mxu0 %v2206_v2 }
 0x4c0   :  { %1962 = vmatpush3.bf16.msra.mxu0 %v2207_v3 }
 0x4c1   :  { %1963 = vmatprep.subr.bf16.mxu0 %v2208_v4 }
 0x4c4   :  { %1964 = vmatpush3.bf16.msra.mxu0 %v2209_v5 }
 0x4c5   :  { %1965 = vmatprep.subr.bf16.mxu0 %v2210_v6 }
 0x4c8   :  { %1966 = vmatpush3.bf16.msra.mxu0 %v2211_v7 }
 0x4c9   :  { %1967 = vmatprep.subr.bf16.mxu0 %v2212_v8 }
 0x4cc   :  { %1968 = vmatpush3.bf16.msra.mxu0 %v2213_v9 }
 0x57b   :  { %v801_v38 = vpop.f32.mrf.mxu0 }
 0x57c   :  { %v2491_v39 = vadd.f32 %v801_v38, %v710_v37 }
 0x57d   :  { %v2067_v40 = vpop.f32.mrf.mxu0 }
 0x57e   :  { %808 = vadd.xlane.f32.xlu0 %v2491_v39  ;;  %v814_v44 = vmul.f32 %v2491_v39, %v2491_v39  ;;  %v2214_v40 = vld [vmem:[#allocation6 + $0xd0] sm:$0xff]  }
 0x57f   :  { %v804_v41 = vpop.f32.mrf.mxu0  ;;  %1969 = vmatprep.subr.bf16.mxu0 %v2214_v40  ;;  %v716_v40 = vld [vmem:[#allocation7 + $0x15] ss:$0 sm:$0xff] }
 0x580   :  { %v2494_v43 = vadd.f32 %v804_v41, %v710_v37  ;;  %v2215_v41 = vld [vmem:[#allocation6 + $0x90] sm:$0xff]  }
 0x581   :  { %v2068_v45 = vpop.f32.mrf.mxu0  ;;  %1970 = vmatpush3.bf16.msra.mxu0 %v2215_v41 }
 0x582   :  { %816 = vadd.xlane.f32.xlu0 %v814_v44  ;;  %810 = vadd.xlane.f32.xlu1 %v2494_v43  ;;  %v815_v46 = vmul.f32 %v2494_v43, %v2494_v43  ;;  %v2217_v44 = vld [vmem:[#allocation6 + $0x88] sm:$0xff]   ;;  %v2219_v45 = vld [vmem:[#allocation6 + $0x80] sm:$0xff]  }
 0x586   :  { %818 = vadd.xlane.f32.xlu1 %v815_v46  ;;  %v712_v46 = vld [vmem:[#allocation7 + $0x11] ss:$8 sm:$0x3] }
 0x587   :  { %v847_v48 = vrot.slane %v712_v46, %v2477_v30  ;;  %v843_v49 = vrot.slane %v712_v46, %v2479_v31 }
 0x607   :  { %v809_v10 = vpop.xlane.xlu0 %808 }
 0x608   :  { %v812_v11 = vmul.f32 0.0078125, %v809_v10 }
 0x60a   :  { %v822_v14 = vmul.f32 %v812_v11, %v812_v11  ;;  %v826_v24 = vsub.f32 %v2491_v39, %v812_v11  ;;  %v2216_v39 = vld [vmem:[#allocation6 + $0xc8] sm:$0xff]  }
 0x60b   :  { %v817_v12 = vpop.xlane.xlu0 %816  ;;  %v811_v13 = vpop.xlane.xlu1 %810  ;;  %1971 = vmatprep.subr.bf16.mxu0 %v2216_v39 }
 0x60c   :  { %v820_v15 = vmul.f32 0.0078125, %v817_v12  ;;  %v813_v16 = vmul.f32 0.0078125, %v811_v13  ;;  %1972 = vmatpush3.bf16.msra.mxu0 %v2217_v44  ;;  %v2220_v13 = vld [vmem:[#allocation4 + $0x228] ss:$12 sps:$4 sm:$0xff]  }
 0x60e   :  { %v824_v17 = vsub.f32 %v820_v15, %v822_v14  ;;  %v823_v20 = vmul.f32 %v813_v16, %v813_v16  ;;  %v827_v28 = vsub.f32 %v2494_v43, %v813_v16  ;;  %v2218_v43 = vld [vmem:[#allocation6 + $0xc0] sm:$0xff]   ;;  %v2224_v16 = vld [vmem:[#allocation4 + $0x1c8] ss:$12 sps:$4 sm:$0xff]  }
 0x60f   :  { %v819_v18 = vpop.xlane.xlu1 %818  ;;  %1973 = vmatprep.subr.bf16.mxu0 %v2218_v43  ;;  %v2222_v14 = vld [vmem:[#allocation4 + $0x1f8] ss:$12 sps:$4 sm:$0xff]   ;;  %v2223_v15 = vld [vmem:[#allocation4 + $0x1e0] ss:$12 sps:$4 sm:$0xff]  }
 0x610   :  { %v828_v19 = vadd.f32 1e-05, %v824_v17  ;;  %v821_v21 = vmul.f32 0.0078125, %v819_v18  ;;  %1974 = vmatpush3.bf16.msra.mxu0 %v2219_v45  ;;  %v2225_v17 = vld [vmem:[#allocation4 + $0x1b0] ss:$12 sps:$4 sm:$0xff]  }
 0x611   :  { %v2226_v18 = vld [vmem:[#allocation4 + $0x198] ss:$12 sps:$4 sm:$0xff]   ;;  %v717_v45 = vld [vmem:[#allocation7 + $0x16] ss:$0 sm:$0xff] }
 0x612   :  { %2284 = vrsqrt.f32 %v828_v19  ;;  %v825_v22 = vsub.f32 %v821_v21, %v823_v20  ;;  %v2227_v19 = vld [vmem:[#allocation4 + $0x180] ss:$12 sps:$4 sm:$0xff]  }
 0x614   :  { %v829_v23 = vadd.f32 1e-05, %v825_v22 }
 0x616   :  { %2286 = vrsqrt.f32 %v829_v23 }
 0x61f   :  { %v2285_v25 = vpop.eup %2284 }
 0x620   :  { %v832_v26 = vmul.f32 %v2285_v25, %v826_v24 }
 0x622   :  { %v834_v33 = vmul.f32 %v832_v26, %v714_v27 }
 0x623   :  { %v2287_v29 = vpop.eup %2286 }
 0x624   :  { %v833_v32 = vmul.f32 %v2287_v29, %v827_v28  ;;  %v836_v36 = vadd.f32 %v834_v33, %v715_v34 }
 0x626   :  { %v835_v35 = vmul.f32 %v833_v32, %v714_v27 }
 0x628   :  { %v837_v37 = vadd.f32 %v835_v35, %v715_v34 }
 0x62a   :  { %v838_v38 = vpack.c.bf16 %v837_v37, %v836_v36 }
 0x62c   :  { %963 = vmatmul.mubr.bf16.vlgmr.msra.gmra.mxu1 %v838_v38 }
 0x62d   :  { %2085 = vmatprep.mubr.msk.bf16.mxu1 %vm2397_vm0, %v2396_v0  ;;  %2070 = vmatpush3.bf16.msra.mxu1 %v2220_v13  ;;  %v2253_v13 = vld [vmem:[#allocation6 + $0x138] sm:$0xff]  }
 0x62e   :  { %2071 = vmatprep.subr.bf16.mxu1 %v2396_v0 }
 0x6ec   :  { %v964_v47 = vpop.f32.mrf.mxu1 }
 0x6ed   :  { %v965_v54 = vadd.f32 %v964_v47, %v843_v49 }
 0x6ee   :  { %v966_v50 = vpop.f32.mrf.mxu1 }
 0x6ef   :  { %v967_v52 = vadd.f32 %v966_v50, %v847_v48  ;;  %v973_v60 = vmax.f32 %v965_v54, 0.0  ;;  %v1214_v50 = vld [vmem:[#allocation7 + $0x20] ss:$0 sm:$0xff] }
 0x6f0   :  { %v968_v51 = vpop.f32.mrf.mxu1 }
 0x6f1   :  { %v969_v53 = vadd.f32 %v968_v51, %v843_v49  ;;  %v974_v58 = vmax.f32 %v967_v52, 0.0 }
 0x6f2   :  { %v970_v55 = vpop.f32.mrf.mxu1 }
 0x6f3   :  { %v971_v56 = vadd.f32 %v970_v55, %v847_v48  ;;  %v975_v57 = vmax.f32 %v969_v53, 0.0 }
 0x6f5   :  { %v976_v59 = vmax.f32 %v971_v56, 0.0  ;;  %v977_v62 = vpack.c.bf16 %v975_v57, %v973_v60  ;;  %v2228_v60 = vld [vmem:[#allocation4 + $0x22c] ss:$12 sps:$4 sm:$0xff]  }
 0x6f7   :  { %v978_v61 = vpack.c.bf16 %v976_v59, %v974_v58  ;;  %v2230_v59 = vld [vmem:[#allocation4 + $0x230] ss:$12 sps:$4 sm:$0xff]  }
 0x6f8   :  { %1434 = vmatprep.subr.bf16.mxu0 %v2230_v59 }
 0x6f9   :  { %1107 = vmatprep.mubr.bf16.mxu0 %v978_v61  ;;  %v2233_v61 = vld [vmem:[#allocation4 + $0x218] ss:$12 sps:$4 sm:$0xff]  }
 0x6fa   :  { %1108 = vmatmul.mubr.bf16.vlgmr.msra.gmra.mxu0 %v977_v62  ;;  %v2231_v62 = vld [vmem:[#allocation4 + $0x214] ss:$12 sps:$4 sm:$0xff]  }
 0x6fb   :  { %1466 = vmatprep.mubr.bf16.mxu0 %v2398_v42  ;;  %v2221_v42 = vld [vmem:[#allocation4 + $0x210] ss:$12 sps:$4 sm:$0xff]   ;;  %1435 = vmatpush1.bf16.msra.mxu0 %v2228_v60 }
 0x6fc   :  { %2072 = vmatpush3.bf16.msra.mxu1 %v2221_v42  ;;  %1436 = vmatprep.subr.bf16.mxu0 %v2233_v61  ;;  %v2254_v42 = vld [vmem:[#allocation6 + $0x170] sm:$0xff]  }
 0x6fd   :  { %2073 = vmatprep.subr.bf16.mxu1 %v2396_v0 }
 0x6ff   :  { %1437 = vmatpush1.bf16.msra.mxu0 %v2231_v62 }
 0x700   :  { %2074 = vmatpush3.bf16.msra.mxu1 %v2222_v14  ;;  %v2255_v14 = vld [vmem:[#allocation6 + $0x130] sm:$0xff]  }
 0x701   :  { %2075 = vmatprep.subr.bf16.mxu1 %v2396_v0 }
 0x704   :  { %2076 = vmatpush3.bf16.msra.mxu1 %v2223_v15  ;;  %v2256_v15 = vld [vmem:[#allocation6 + $0x168] sm:$0xff]  }
 0x705   :  { %2077 = vmatprep.subr.bf16.mxu1 %v2396_v0 }
 0x708   :  { %2078 = vmatpush3.bf16.msra.mxu1 %v2224_v16  ;;  %v2257_v16 = vld [vmem:[#allocation6 + $0x128] sm:$0xff]  }
 0x709   :  { %2079 = vmatprep.subr.bf16.mxu1 %v2396_v0 }
 0x70c   :  { %2080 = vmatpush3.bf16.msra.mxu1 %v2225_v17  ;;  %v2258_v17 = vld [vmem:[#allocation6 + $0x160] sm:$0xff]  }
 0x70d   :  { %2081 = vmatprep.subr.bf16.mxu1 %v2396_v0 }
 0x710   :  { %2082 = vmatpush3.bf16.msra.mxu1 %v2226_v18  ;;  %v2259_v18 = vld [vmem:[#allocation6 + $0x120] sm:$0xff]  }
 0x711   :  { %2083 = vmatprep.subr.bf16.mxu1 %v2396_v0 }
 0x714   :  { %2084 = vmatpush3.bf16.msra.mxu1 %v2227_v19  ;;  %v2260_v19 = vld [vmem:[#allocation6 + $0x158] sm:$0xff]  }
 0x7ba   :  { %v1975_v63 = vpop.f32.mrf.mxu0 }
 0x7bc   :  { %v1976_v2 = vpop.f32.mrf.mxu0 }
 0x7bd   :  { %v1977_v3 = vadd.f32 %v1976_v2, %v1975_v63  ;;  %v2236_v63 = vld [vmem:[#allocation4 + $0x200] ss:$12 sps:$4 sm:$0xff]   ;;  %v2237_v2 = vld [vmem:[#allocation4 + $0x1e4] ss:$12 sps:$4 sm:$0xff]  }
 0x7be   :  { %v1978_v4 = vpop.f32.mrf.mxu0  ;;  %1438 = vmatprep.subr.bf16.mxu0 %v2236_v63 }
 0x7bf   :  { %v1110_v5 = vadd.f32 %v1977_v3, %v713_v1  ;;  %v2239_v3 = vld [vmem:[#allocation4 + $0x1e8] ss:$12 sps:$4 sm:$0xff]  }
 0x7c0   :  { %v1979_v6 = vpop.f32.mrf.mxu0 }
 0x7c1   :  { %v1980_v7 = vadd.f32 %v1979_v6, %v1978_v4  ;;  %v1116_v8 = vadd.f32 %v1110_v5, %v836_v36  ;;  %v2242_v4 = vld [vmem:[#allocation4 + $0x1d0] ss:$12 sps:$4 sm:$0xff]   ;;  %v2240_v5 = vld [vmem:[#allocation4 + $0x1cc] ss:$12 sps:$4 sm:$0xff]  }
 0x7c2   :  { %v2245_v6 = vld [vmem:[#allocation4 + $0x1b8] ss:$12 sps:$4 sm:$0xff]  }
 0x7c3   :  { %v1113_v9 = vadd.f32 %v1980_v7, %v713_v1  ;;  %1118 = vadd.xlane.f32.xlu0 %v1116_v8  ;;  %v1124_v11 = vmul.f32 %v1116_v8, %v1116_v8  ;;  %v2234_v1 = vld [vmem:[#allocation4 + $0x1fc] ss:$12 sps:$4 sm:$0xff]   ;;  %v2243_v7 = vld [vmem:[#allocation4 + $0x1b4] ss:$12 sps:$4 sm:$0xff]  }
 0x7c4   :  { %1439 = vmatpush1.bf16.msra.mxu0 %v2234_v1 }
 0x7c5   :  { %v1117_v10 = vadd.f32 %v1113_v9, %v837_v37  ;;  %1440 = vmatprep.subr.bf16.mxu0 %v2239_v3  ;;  %v2246_v9 = vld [vmem:[#allocation4 + $0x19c] ss:$12 sps:$4 sm:$0xff]  }
 0x7c7   :  { %1120 = vadd.xlane.f32.xlu1 %v1117_v10  ;;  %1126 = vadd.xlane.f32.xlu0 %v1124_v11  ;;  %v1125_v12 = vmul.f32 %v1117_v10, %v1117_v10  ;;  %v2249_v11 = vld [vmem:[#allocation4 + $0x184] ss:$12 sps:$4 sm:$0xff]  }
 0x7c8   :  { %1441 = vmatpush1.bf16.msra.mxu0 %v2237_v2 }
 0x7c9   :  { %1442 = vmatprep.subr.bf16.mxu0 %v2242_v4 }
 0x7cb   :  { %1128 = vadd.xlane.f32.xlu1 %v1125_v12  ;;  %v2252_v12 = vld [vmem:[#allocation6 + $0x178] sm:$0xff]  }
 0x7cc   :  { %1443 = vmatpush1.bf16.msra.mxu0 %v2240_v5  ;;  %1990 = vmatprep.subr.bf16.mxu1 %v2252_v12  ;;  %v1217_v12 = vld [vmem:[#allocation7 + $0x22] ss:$0 sm:$0xff] }
 0x7cd   :  { %1444 = vmatprep.subr.bf16.mxu0 %v2245_v6 }
 0x7d0   :  { %1445 = vmatpush1.bf16.msra.mxu0 %v2243_v7 }
 0x84c   :  { %v1119_v20 = vpop.xlane.xlu0 %1118 }
 0x84d   :  { %v1122_v21 = vmul.f32 0.0078125, %v1119_v20  ;;  %v2261_v20 = vld [vmem:[#allocation6 + $0x118] sm:$0xff]  }
 0x84f   :  { %v1132_v24 = vmul.f32 %v1122_v21, %v1122_v21  ;;  %v1136_v36 = vsub.f32 %v1116_v8, %v1122_v21  ;;  %v2248_v8 = vld [vmem:[#allocation4 + $0x1a0] ss:$12 sps:$4 sm:$0xff]  }
 0x850   :  { %v1121_v22 = vpop.xlane.xlu1 %1120  ;;  %v1127_v23 = vpop.xlane.xlu0 %1126  ;;  %1446 = vmatprep.subr.bf16.mxu0 %v2248_v8 }
 0x851   :  { %v1123_v25 = vmul.f32 0.0078125, %v1121_v22  ;;  %v1130_v26 = vmul.f32 0.0078125, %v1127_v23  ;;  %1447 = vmatpush1.bf16.msra.mxu0 %v2246_v9 }
 0x853   :  { %v1134_v27 = vsub.f32 %v1130_v26, %v1132_v24  ;;  %v1133_v29 = vmul.f32 %v1123_v25, %v1123_v25  ;;  %v1137_v41 = vsub.f32 %v1117_v10, %v1123_v25  ;;  %v2251_v10 = vld [vmem:[#allocation4 + $0x188] ss:$12 sps:$4 sm:$0xff]  }
 0x854   :  { %v1129_v28 = vpop.xlane.xlu1 %1128  ;;  %1448 = vmatprep.subr.bf16.mxu0 %v2251_v10 }
 0x855   :  { %v1138_v32 = vadd.f32 1e-05, %v1134_v27  ;;  %v1131_v33 = vmul.f32 0.0078125, %v1129_v28  ;;  %1449 = vmatpush1.bf16.msra.mxu0 %v2249_v11 }
 0x856   :  { %2089 = vmatprep.subr.bf16.mxu0 %v2396_v0 }
 0x857   :  { %2288 = vrsqrt.f32 %v1138_v32  ;;  %v1135_v34 = vsub.f32 %v1131_v33, %v1133_v29 }
 0x859   :  { %v1139_v35 = vadd.f32 1e-05, %v1135_v34 }
 0x85b   :  { %2290 = vrsqrt.f32 %v1139_v35 }
 0x864   :  { %v2289_v37 = vpop.eup %2288 }
 0x865   :  { %v1142_v38 = vmul.f32 %v2289_v37, %v1136_v36 }
 0x867   :  { %v1144_v43 = vmul.f32 %v1142_v38, %v716_v40 }
 0x868   :  { %v2291_v39 = vpop.eup %2290 }
 0x869   :  { %v1143_v44 = vmul.f32 %v2291_v39, %v1137_v41  ;;  %v1146_v47 = vadd.f32 %v1144_v43, %v717_v45  ;;  %v1218_v41 = vld [vmem:[#allocation7 + $0x23] ss:$0 sm:$0xff] }
 0x86b   :  { %v1145_v46 = vmul.f32 %v1143_v44, %v716_v40 }
 0x86d   :  { %v1147_v48 = vadd.f32 %v1145_v46, %v717_v45  ;;  %v1219_v46 = vld [vmem:[#allocation7 + $0x24] ss:$0 sm:$0xff] }
 0x86f   :  { %v1222_v49 = vpack.c.bf16 %v1147_v48, %v1146_v47 }
 0x871   :  { %2086 = vmatmul.mubr.bf16.vlgmr.msra.gmra.mxu1 %v1222_v49 }
 0x872   :  { %1991 = vmatpush3.bf16.msra.mxu1 %v2253_v13 }
 0x873   :  { %1992 = vmatprep.subr.bf16.mxu1 %v2254_v42 }
 0x876   :  { %1993 = vmatpush3.bf16.msra.mxu1 %v2255_v14 }
 0x877   :  { %1994 = vmatprep.subr.bf16.mxu1 %v2256_v15 }
 0x87a   :  { %1995 = vmatpush3.bf16.msra.mxu1 %v2257_v16 }
 0x87b   :  { %1996 = vmatprep.subr.bf16.mxu1 %v2258_v17 }
 0x87e   :  { %1997 = vmatpush3.bf16.msra.mxu1 %v2259_v18 }
 0x87f   :  { %1998 = vmatprep.subr.bf16.mxu1 %v2260_v19 }
 0x882   :  { %1999 = vmatpush3.bf16.msra.mxu1 %v2261_v20 }
 0x931   :  { %v1305_v51 = vpop.f32.mrf.mxu1 }
 0x932   :  { %v2516_v52 = vadd.f32 %v1305_v51, %v1214_v50  ;;  %v2262_v51 = vld [vmem:[#allocation6 + $0x150] sm:$0xff]  }
 0x933   :  { %v2087_v53 = vpop.f32.mrf.mxu1  ;;  %2000 = vmatprep.subr.bf16.mxu1 %v2262_v51 }
 0x934   :  { %1312 = vadd.xlane.f32.xlu0 %v2516_v52  ;;  %v1318_v56 = vmul.f32 %v2516_v52, %v2516_v52  ;;  %v2263_v53 = vld [vmem:[#allocation6 + $0x110] sm:$0xff]  }
 0x935   :  { %v1308_v54 = vpop.f32.mrf.mxu1  ;;  %2001 = vmatpush3.bf16.msra.mxu1 %v2263_v53 }
 0x936   :  { %v2519_v55 = vadd.f32 %v1308_v54, %v1214_v50  ;;  %v2265_v54 = vld [vmem:[#allocation6 + $0x108] sm:$0xff]  }
 0x937   :  { %v2088_v57 = vpop.f32.mrf.mxu1 }
 0x938   :  { %1320 = vadd.xlane.f32.xlu0 %v1318_v56  ;;  %1314 = vadd.xlane.f32.xlu1 %v2519_v55  ;;  %v1319_v58 = vmul.f32 %v2519_v55, %v2519_v55  ;;  %v2267_v56 = vld [vmem:[#allocation6 + $0x100] sm:$0xff]  }
 0x939   :  { %v1216_v57 = vld [vmem:[#allocation7 + $0x21] ss:$8 sm:$0x3] }
 0x93a   :  { %v1351_v59 = vrot.slane %v1216_v57, %v2477_v30  ;;  %v1347_v60 = vrot.slane %v1216_v57, %v2479_v31 }
 0x93c   :  { %1322 = vadd.xlane.f32.xlu1 %v1319_v58 }
 0x9bd   :  { %v1313_v21 = vpop.xlane.xlu0 %1312 }
 0x9be   :  { %v1316_v22 = vmul.f32 0.0078125, %v1313_v21  ;;  %v2268_v21 = vld [vmem:[#allocation2 + $0x48] sm:$0xff]  }
 0x9c0   :  { %v1326_v25 = vmul.f32 %v1316_v22, %v1316_v22  ;;  %v1330_v37 = vsub.f32 %v2516_v52, %v1316_v22  ;;  %v2264_v52 = vld [vmem:[#allocation6 + $0x148] sm:$0xff]   ;;  %v2269_v22 = vld [vmem:[#allocation2 + $0x40] sm:$0xff]  }
 0x9c1   :  { %v1321_v23 = vpop.xlane.xlu0 %1320  ;;  %v1315_v24 = vpop.xlane.xlu1 %1314  ;;  %2002 = vmatprep.subr.bf16.mxu1 %v2264_v52  ;;  %v1221_v52 = vld [vmem:[#allocation7 + $0x26] ss:$0 sm:$0xff] }
 0x9c2   :  { %v1324_v26 = vmul.f32 0.0078125, %v1321_v23  ;;  %v1317_v27 = vmul.f32 0.0078125, %v1315_v24  ;;  %2003 = vmatpush3.bf16.msra.mxu1 %v2265_v54  ;;  %v2270_v23 = vld [vmem:[#allocation2 + $0x38] sm:$0xff]   ;;  %v2271_v24 = vld [vmem:[#allocation2 + $0x30] sm:$0xff]  }
 0x9c4   :  { %v1328_v28 = vsub.f32 %v1324_v26, %v1326_v25  ;;  %v1327_v33 = vmul.f32 %v1317_v27, %v1317_v27  ;;  %v1331_v39 = vsub.f32 %v2519_v55, %v1317_v27  ;;  %v2266_v55 = vld [vmem:[#allocation6 + $0x140] sm:$0xff]   ;;  %v2272_v25 = vld [vmem:[#allocation2 + $0x28] sm:$0xff]   ;;  %v2273_v26 = vld [vmem:[#allocation2 + $0x20] sm:$0xff]  }
 0x9c5   :  { %v1323_v29 = vpop.xlane.xlu1 %1322  ;;  %2004 = vmatprep.subr.bf16.mxu1 %v2266_v55  ;;  %v2274_v27 = vld [vmem:[#allocation2 + $0x18] sm:$0xff]  }
 0x9c6   :  { %v1332_v32 = vadd.f32 1e-05, %v1328_v28  ;;  %v1325_v34 = vmul.f32 0.0078125, %v1323_v29  ;;  %2005 = vmatpush3.bf16.msra.mxu1 %v2267_v56  ;;  %v2275_v28 = vld [vmem:[#allocation2 + $0x10] sm:$0xff]  }
 0x9c8   :  { %2292 = vrsqrt.f32 %v1332_v32  ;;  %v1329_v35 = vsub.f32 %v1325_v34, %v1327_v33 }
 0x9ca   :  { %v1333_v36 = vadd.f32 1e-05, %v1329_v35 }
 0x9cc   :  { %2294 = vrsqrt.f32 %v1333_v36 }
 0x9d5   :  { %v2293_v38 = vpop.eup %2292 }
 0x9d6   :  { %v1336_v40 = vmul.f32 %v2293_v38, %v1330_v37 }
 0x9d8   :  { %v1338_v45 = vmul.f32 %v1336_v40, %v1218_v41 }
 0x9d9   :  { %v2295_v44 = vpop.eup %2294 }
 0x9da   :  { %v1337_v43 = vmul.f32 %v2295_v44, %v1331_v39  ;;  %v1340_v48 = vadd.f32 %v1338_v45, %v1219_v46 }
 0x9dc   :  { %v1339_v47 = vmul.f32 %v1337_v43, %v1218_v41 }
 0x9de   :  { %v1341_v49 = vadd.f32 %v1339_v47, %v1219_v46 }
 0x9e0   :  { %v1342_v50 = vpack.c.bf16 %v1341_v49, %v1340_v48 }
 0x9e2   :  { %1467 = vmatmul.mubr.bf16.vlgmr.msra.gmra.mxu0 %v1342_v50 }
 0x9e3   :  { %2105 = vmatprep.mubr.msk.bf16.mxu0 %vm2397_vm0, %v2396_v0  ;;  %2090 = vmatpush3.bf16.msra.mxu0 %v2268_v21 }
 0x9e4   :  { %2091 = vmatprep.subr.bf16.mxu0 %v2396_v0 }
 0x9e7   :  { %2092 = vmatpush3.bf16.msra.mxu0 %v2269_v22 }
 0x9e8   :  { %2093 = vmatprep.subr.bf16.mxu0 %v2396_v0 }
 0x9eb   :  { %2094 = vmatpush3.bf16.msra.mxu0 %v2270_v23 }
 0x9ec   :  { %2095 = vmatprep.subr.bf16.mxu0 %v2396_v0 }
 0x9ef   :  { %2096 = vmatpush3.bf16.msra.mxu0 %v2271_v24 }
 0x9f0   :  { %2097 = vmatprep.subr.bf16.mxu0 %v2396_v0 }
 0x9f3   :  { %2098 = vmatpush3.bf16.msra.mxu0 %v2272_v25 }
 0x9f4   :  { %2099 = vmatprep.subr.bf16.mxu0 %v2396_v0 }
 0x9f7   :  { %2100 = vmatpush3.bf16.msra.mxu0 %v2273_v26 }
 0x9f8   :  { %2101 = vmatprep.subr.bf16.mxu0 %v2396_v0 }
 0x9fb   :  { %2102 = vmatpush3.bf16.msra.mxu0 %v2274_v27 }
 0x9fc   :  { %2103 = vmatprep.subr.bf16.mxu0 %v2396_v0 }
 0x9ff   :  { %2104 = vmatpush3.bf16.msra.mxu0 %v2275_v28 }
 0xaa2   :  { %v1468_v58 = vpop.f32.mrf.mxu0 }
 0xaa3   :  { %v1469_v2 = vadd.f32 %v1468_v58, %v1347_v60 }
 0xaa4   :  { %v1470_v61 = vpop.f32.mrf.mxu0 }
 0xaa5   :  { %v1471_v63 = vadd.f32 %v1470_v61, %v1351_v59  ;;  %v1477_v8 = vmax.f32 %v1469_v2, 0.0 }
 0xaa6   :  { %v1472_v62 = vpop.f32.mrf.mxu0 }
 0xaa7   :  { %v1473_v1 = vadd.f32 %v1472_v62, %v1347_v60  ;;  %v1478_v6 = vmax.f32 %v1471_v63, 0.0 }
 0xaa8   :  { %v1474_v3 = vpop.f32.mrf.mxu0 }
 0xaa9   :  { %v1475_v4 = vadd.f32 %v1474_v3, %v1351_v59  ;;  %v1479_v5 = vmax.f32 %v1473_v1, 0.0  ;;  %v1668_v59 = vld [vmem:[#allocation7 + $0x31] ss:$0 sm:$0xff] }
 0xaab   :  { %v1480_v7 = vmax.f32 %v1475_v4, 0.0  ;;  %v1481_v10 = vpack.c.bf16 %v1479_v5, %v1477_v8 }
 0xaad   :  { %v1482_v9 = vpack.c.bf16 %v1480_v7, %v1478_v6 }
 0xaaf   :  { %1611 = vmatprep.mubr.bf16.mxu1 %v1482_v9 }
 0xab0   :  { %1612 = vmatmul.mubr.bf16.vlgmr.msra.gmra.mxu1 %v1481_v10 }
 0xb70   :  { %v2006_v11 = vpop.f32.mrf.mxu1 }
 0xb72   :  { %v2007_v30 = vpop.f32.mrf.mxu1 }
 0xb73   :  { %v2008_v13 = vadd.f32 %v2007_v30, %v2006_v11 }
 0xb74   :  { %v2009_v31 = vpop.f32.mrf.mxu1 }
 0xb75   :  { %v1614_v42 = vadd.f32 %v2008_v13, %v1217_v12 }
 0xb76   :  { %v2010_v14 = vpop.f32.mrf.mxu1 }
 0xb77   :  { %v2011_v15 = vadd.f32 %v2010_v14, %v2009_v31  ;;  %v1620_v16 = vadd.f32 %v1614_v42, %v1340_v48  ;;  %v1220_v48 = vld [vmem:[#allocation7 + $0x25] ss:$0 sm:$0xff] }
 0xb79   :  { %v1617_v17 = vadd.f32 %v2011_v15, %v1217_v12  ;;  %1622 = vadd.xlane.f32.xlu0 %v1620_v16  ;;  %v1628_v19 = vmul.f32 %v1620_v16, %v1620_v16 }
 0xb7b   :  { %v1621_v18 = vadd.f32 %v1617_v17, %v1341_v49 }
 0xb7d   :  { %1624 = vadd.xlane.f32.xlu1 %v1621_v18  ;;  %1630 = vadd.xlane.f32.xlu0 %v1628_v19  ;;  %v1629_v20 = vmul.f32 %v1621_v18, %v1621_v18 }
 0xb81   :  { %1632 = vadd.xlane.f32.xlu1 %v1629_v20 }
 0xc02   :  { %v1623_v29 = vpop.xlane.xlu0 %1622 }
 0xc03   :  { %v1626_v32 = vmul.f32 0.0078125, %v1623_v29 }
 0xc05   :  { %v1636_v35 = vmul.f32 %v1626_v32, %v1626_v32  ;;  %v1640_v46 = vsub.f32 %v1620_v16, %v1626_v32 }
 0xc06   :  { %v1625_v33 = vpop.xlane.xlu1 %1624  ;;  %v1631_v34 = vpop.xlane.xlu0 %1630 }
 0xc07   :  { %v1627_v36 = vmul.f32 0.0078125, %v1625_v33  ;;  %v1634_v37 = vmul.f32 0.0078125, %v1631_v34 }
 0xc09   :  { %v1638_v38 = vsub.f32 %v1634_v37, %v1636_v35  ;;  %v1637_v41 = vmul.f32 %v1627_v36, %v1627_v36  ;;  %v1641_v49 = vsub.f32 %v1621_v18, %v1627_v36 }
 0xc0a   :  { %v1633_v40 = vpop.xlane.xlu1 %1632 }
 0xc0b   :  { %v1642_v39 = vadd.f32 1e-05, %v1638_v38  ;;  %v1635_v44 = vmul.f32 0.0078125, %v1633_v40 }
 0xc0d   :  { %2296 = vrsqrt.f32 %v1642_v39  ;;  %v1639_v43 = vsub.f32 %v1635_v44, %v1637_v41 }
 0xc0f   :  { %v1643_v45 = vadd.f32 1e-05, %v1639_v43 }
 0xc11   :  { %2298 = vrsqrt.f32 %v1643_v45 }
 0xc1a   :  { %v2297_v47 = vpop.eup %2296 }
 0xc1b   :  { %v1646_v0 = vmul.f32 %v2297_v47, %v1640_v46 }
 0xc1d   :  { %v1648_v53 = vmul.f32 %v1646_v0, %v1220_v48 }
 0xc1e   :  { %v2299_v50 = vpop.eup %2298 }
 0xc1f   :  { %v1647_v51 = vmul.f32 %v2299_v50, %v1641_v49  ;;  %v1650_v55 = vadd.f32 %v1648_v53, %v1221_v52 }
 0xc21   :  { %v1649_v54 = vmul.f32 %v1647_v51, %v1220_v48 }
 0xc23   :  { %v1651_v56 = vadd.f32 %v1649_v54, %v1221_v52 }
 0xc25   :  { %v1669_v57 = vpack.c.bf16 %v1651_v56, %v1650_v55 }
 0xc27   :  { %2106 = vmatmul.mubr.bf16.vlgmr.msra.gmra.mxu0 %v1669_v57 }
 0xce7   :  { %v1752_v58 = vpop.f32.mrf.mxu0 }
 0xce8   :  { %v1753_v62 = vadd.f32 %v1752_v58, %v1668_v59 }
 0xce9   :  { %v2107_v60 = vpop.f32.mrf.mxu0 }
 0xceb   :  { %v1755_v61 = vpop.f32.mrf.mxu0 }
 0xcec   :  { %v1756_v63 = vadd.f32 %v1755_v61, %v1668_v59 }
 0xced   :  { %v2108_v1 = vpop.f32.mrf.mxu0 }
 0xcee   :  { %v1914_v2 = vpack.c.bf16 %v1756_v63, %v1753_v62 }
 0xcf0   :  { %1915 = vst [vmem:[%s2548_s5] sm:$0xff] %v1914_v2  }
 0xcf1   :  { %1773 = vsyncpa [#allocation3], 1 }
 0xcf2   :  { %1774 = vsyncpa [#allocation5], 1 }
 0xcf3   :  { %1775 = vsyncpa [#allocation8], 1 }

</bundles_post_ra>
